<compile_context>
chip_gen: v6e
topology: v6e:2x2x1
jax: 0.10.0
libtpu: 0.0.40
codegen_flags: <defaults>
</compile_context>

<pallas_src>
import jax
import jax.numpy as jnp
import numpy as np
from jax import lax
from jax.experimental import pallas as pl
from jax.experimental.pallas import tpu as pltpu


def _loop(n, body, *, full_unroll_max, fori_unroll):
    """Run body(i) for i in [0, n): full Python unroll for small static n,
    otherwise a partially-unrolled fori_loop (body mutates refs only)."""
    if n <= full_unroll_max:
        for i in range(n):
            body(i)
    else:
        def wrapped(i, carry):
            body(i)
            return carry
        lax.fori_loop(0, n, wrapped, 0, unroll=min(fori_unroll, n))


# ----------------------------------------------------------------------------
# Fused kernel.  Grid = (batch_blocks, num_layers); per grid step the refs are:
#   x_ref   : (T, Bb, H)  f32   embedded tokens for this batch block (l-const)
#   mask_ref: (T, Bb, 1)  f32   1.0 where t < length else 0.0       (l-const)
#   wih_ref : (1, H, 4H)  bf16/f32  W_ih^T of layer l, gate cols (i,f,o,g)
#   whh_ref : (1, H, 4H)  bf16/f32  W_hh^T of layer l, gate cols (i,f,o,g)
#   b_ref   : (1, 1, 4H)  f32       b_ih + b_hh of layer l
#   y_ref   : (T, Bb, H)  f32   activation buffer / final output (resident
#                               across the layer axis; written back at the end)
#   h_ref   : (Bb, H)     f32   hidden state at last valid timestep
#   c_ref   : (Bb, H)     f32   cell   state at last valid timestep
# Scratch:
#   gx_s    : (TC, Bb, 4H) f32  hoisted input projection for one time chunk
#   h_s,c_s : (Bb, H)      f32  recurrent state
# ----------------------------------------------------------------------------
def _encoder_lstm_stack_kernel(x_ref, mask_ref, wih_ref, whh_ref, b_ref,
                               y_ref, h_ref, c_ref, gx_s, h_s, c_s):
    layer = pl.program_id(1)
    T_pad, Bb, H = x_ref.shape
    G = 4 * H
    TC = gx_s.shape[0]
    n_chunks = T_pad // TC
    mm_dtype = wih_ref.dtype                 # matmul operand dtype (bf16/f32)

    # Layer 0: seed the resident activation buffer with the embeddings.
    @pl.when(layer == 0)
    def _():
        y_ref[...] = x_ref[...]

    wih = wih_ref[0]                         # (H, 4H) gate cols (i,f,o,g)
    whh = whh_ref[0]                         # (H, 4H)
    bias = b_ref[0]                          # (1, 4H) f32

    h_s[...] = jnp.zeros_like(h_s)           # fresh zero state per layer
    c_s[...] = jnp.zeros_like(c_s)

    def run_chunk(ci):
        if isinstance(ci, (int, np.integer)):
            t0 = ci * TC
        else:
            t0 = pl.multiple_of(ci * TC, TC)

        # Hoisted input projection for this chunk: one MXU matmul covering
        # TC timesteps, written to scratch (bounds register pressure).
        xin = y_ref[pl.ds(t0, TC)].reshape(TC * Bb, H)
        gx_s[...] = (jnp.dot(xin.astype(mm_dtype), wih,
                             preferred_element_type=jnp.float32)
                     + bias).reshape(TC, Bb, G)

        def step(tt):
            idx = t0 + tt
            # Precomputed validity mask; single broadcast per step.
            m = mask_ref[idx]                            # (Bb, 1) in {0, 1}
            mB = jnp.broadcast_to(m, (Bb, H))
            nmB = 1.0 - mB

            # Recurrent projection (only h @ W_hh stays inside the recurrence).
            g = gx_s[tt] + jnp.dot(h_s[...].astype(mm_dtype), whh,
                                   preferred_element_type=jnp.float32)

            # Gate cols permuted to (i, f, o, g): contiguous sigmoid / tanh.
            s = jax.nn.sigmoid(g[:, :3 * H])
            i_g = s[:, 0 * H:1 * H]
            f_g = s[:, 1 * H:2 * H]
            o_g = s[:, 2 * H:3 * H]
            g_g = jnp.tanh(g[:, 3 * H:])

            c_new = f_g * c_s[...] + i_g * g_g
            h_new = o_g * jnp.tanh(c_new)

            # Freeze state past the sequence end (exact 0/1 arithmetic blend).
            c_s[...] = mB * c_new + nmB * c_s[...]
            h_s[...] = mB * h_new + nmB * h_s[...]

            # pad_packed gives 0 at padded steps; residual adds the layer
            # input (= old buffer content), read before overwrite.
            x_t = y_ref[idx]                             # (Bb, H) old value
            y_ref[pl.ds(idx, 1)] = (mB * h_new + x_t)[None]

        _loop(TC, step, full_unroll_max=8, fori_unroll=4)

    _loop(n_chunks, run_chunk, full_unroll_max=4, fori_unroll=1)

    # Last layer's write survives (output blocks are written back at grid end).
    h_ref[...] = h_s[...]
    c_ref[...] = c_s[...]


def encoder_lstm_stack(x, lengths, layer_params, *, matmul_dtype=jnp.bfloat16,
                       t_chunk=32, batch_blocks=1):
    """x: (T, B, H) f32; lengths: (B,) int32; layer_params: list of PyTorch-
    shaped LSTM params {w_ih (4H,H), w_hh (4H,H), b_ih (4H,), b_hh (4H,)}.
    Returns y (T, B, H), h (B, H), c (B, H)."""
    T, B, H = x.shape
    L = len(layer_params)
    G = 4 * H

    # bf16 packs two rows per sublane -> pad batch to 16 rows per block; 8 for f32.
    row_mult = 16 if jnp.dtype(matmul_dtype).itemsize < 4 else 8
    blk_mult = row_mult * batch_blocks
    B_pad = max(blk_mult, -(-B // blk_mult) * blk_mult)
    Bb = B_pad // batch_blocks

    TC = min(t_chunk, T)
    T_pad = -(-T // TC) * TC

    def permute_gates(m):
        # column blocks (i, f, g, o) -> (i, f, o, g)
        return jnp.concatenate([m[:, :2 * H], m[:, 3 * H:], m[:, 2 * H:3 * H]],
                               axis=1)

    wihs, whhs, bs = [], [], []
    for p in layer_params:
        wih_t = jnp.asarray(p["w_ih"], jnp.float32).T            # (H, 4H)
        whh_t = jnp.asarray(p["w_hh"], jnp.float32).T            # (H, 4H)
        b = (jnp.asarray(p["b_ih"], jnp.float32)
             + jnp.asarray(p["b_hh"], jnp.float32)).reshape(1, G)
        wihs.append(permute_gates(wih_t))
        whhs.append(permute_gates(whh_t))
        bs.append(permute_gates(b))
    wih_all = jnp.stack(wihs).astype(matmul_dtype)               # (L, H, 4H)
    whh_all = jnp.stack(whhs).astype(matmul_dtype)               # (L, H, 4H)
    b_all = jnp.stack(bs)                                        # (L, 1, 4H) f32

    # Pad activations / lengths; precompute the validity mask once.
    x_p = jnp.zeros((T_pad, B_pad, H), jnp.float32)
    x_p = x_p.at[:T, :B].set(x.astype(jnp.float32))
    lens_p = jnp.zeros((B_pad,), jnp.int32).at[:B].set(
        jnp.asarray(lengths, jnp.int32))
    mask = (jnp.arange(T_pad, dtype=jnp.int32)[:, None] < lens_p[None, :]
            ).astype(jnp.float32)[:, :, None]                    # (T_pad, B_pad, 1)

    y, h, c = pl.pallas_call(
        _encoder_lstm_stack_kernel,
        out_shape=(jax.ShapeDtypeStruct((T_pad, B_pad, H), jnp.float32),
                   jax.ShapeDtypeStruct((B_pad, H), jnp.float32),
                   jax.ShapeDtypeStruct((B_pad, H), jnp.float32)),
        grid=(batch_blocks, L),
        in_specs=[
            pl.BlockSpec((T_pad, Bb, H), lambda bb, l: (0, bb, 0)),   # x
            pl.BlockSpec((T_pad, Bb, 1), lambda bb, l: (0, bb, 0)),   # mask
            pl.BlockSpec((1, H, G), lambda bb, l: (l, 0, 0)),         # W_ih^T
            pl.BlockSpec((1, H, G), lambda bb, l: (l, 0, 0)),         # W_hh^T
            pl.BlockSpec((1, 1, G), lambda bb, l: (l, 0, 0)),         # bias
        ],
        out_specs=(
            pl.BlockSpec((T_pad, Bb, H), lambda bb, l: (0, bb, 0)),   # y
            pl.BlockSpec((Bb, H), lambda bb, l: (bb, 0)),             # h
            pl.BlockSpec((Bb, H), lambda bb, l: (bb, 0)),             # c
        ),
        scratch_shapes=[pltpu.VMEM((TC, Bb, G), jnp.float32),
                        pltpu.VMEM((Bb, H), jnp.float32),
                        pltpu.VMEM((Bb, H), jnp.float32)],
        compiler_params=pltpu.CompilerParams(
            dimension_semantics=("parallel", "arbitrary"),
            vmem_limit_bytes=32 * 1024 * 1024),
    )(x_p, mask, wih_all, whh_all, b_all)

    return y[:T, :B], h[:B], c[:B]


# ----------------------------------------------------------------------------
# Pure-JAX reference (mirrors pack_padded_sequence + nn.LSTM + pad_packed + skip)
# ----------------------------------------------------------------------------
def _ref_lstm_residual_layer(x, lengths, w_ih, w_hh, b_ih, b_hh):
    T, B, H = x.shape
    lens = jnp.asarray(lengths, jnp.int32)

    def step(carry, inp):
        h, c = carry
        x_t, t = inp
        gates = x_t @ w_ih.T + h @ w_hh.T + b_ih + b_hh
        i_g = jax.nn.sigmoid(gates[:, :H])
        f_g = jax.nn.sigmoid(gates[:, H:2 * H])
        g_g = jnp.tanh(gates[:, 2 * H:3 * H])
        o_g = jax.nn.sigmoid(gates[:, 3 * H:])
        c_new = f_g * c + i_g * g_g
        h_new = o_g * jnp.tanh(c_new)
        valid = (lens > t)[:, None]
        h2 = jnp.where(valid, h_new, h)
        c2 = jnp.where(valid, c_new, c)
        y = jnp.where(valid, h_new, 0.0) + x_t
        return (h2, c2), y

    (h, c), ys = lax.scan(step,
                          (jnp.zeros((B, H), jnp.float32),
                           jnp.zeros((B, H), jnp.float32)),
                          (x, jnp.arange(T)))
    return ys, h, c


# ----------------------------------------------------------------------------
# NormalEncoder forward
# ----------------------------------------------------------------------------
def normal_encoder_forward(inputs, params, num_layers, *,
                           matmul_dtype=jnp.bfloat16, t_chunk=32,
                           batch_blocks=1):
    """inputs: list of 1-D int token arrays (variable length)."""
    lengths = [int(len(s)) for s in inputs]
    B = len(inputs)
    T = max(lengths)

    # pad_sequence (time-major, pad value 0) — single host-side numpy fill,
    # no per-sequence XLA dispatches.
    padded_np = np.zeros((T, B), np.int32)
    for b, seq in enumerate(inputs):
        padded_np[:lengths[b], b] = np.asarray(seq, np.int32)
    padded = jnp.asarray(padded_np)
    lengths_arr = jnp.asarray(lengths, jnp.int32)

    # embedding lookup (glue; gather stays in plain JAX)
    x = params["embedding"][padded]                      # (T, B, H)

    y, h, c = encoder_lstm_stack(x, lengths_arr, params["layers"][:num_layers],
                                 matmul_dtype=matmul_dtype, t_chunk=t_chunk,
                                 batch_blocks=batch_blocks)

    hx = h[None]                                         # (1, B, H) like PyTorch
    cx = c[None]
    ys = [y[:lengths[b], b, :] for b in range(B)]        # trimmed per-seq outputs
    return ys, (hx, cx), y, padded, lengths_arr


if __name__ == "__main__":
    # config (small, consistent with the module)
    DICT_SIZE_1 = 50
    MODEL_SIZE = 32
    NUM_LAYER = 2

    key = jax.random.PRNGKey(0)
    k_emb, k_tok, k_tok_b, k_w = jax.random.split(key, 4)

    bound = 1.0 / jnp.sqrt(jnp.float32(MODEL_SIZE))
    params = {"embedding": jax.random.normal(k_emb, (DICT_SIZE_1, MODEL_SIZE),
                                             jnp.float32),
              "layers": []}
    wkeys = jax.random.split(k_w, NUM_LAYER * 4)
    for i in range(NUM_LAYER):
        k0, k1, k2, k3 = wkeys[4 * i:4 * i + 4]
        params["layers"].append({
            "w_ih": jax.random.uniform(k0, (4 * MODEL_SIZE, MODEL_SIZE),
                                       jnp.float32, -bound, bound),
            "w_hh": jax.random.uniform(k1, (4 * MODEL_SIZE, MODEL_SIZE),
                                       jnp.float32, -bound, bound),
            "b_ih": jax.random.uniform(k2, (4 * MODEL_SIZE,),
                                       jnp.float32, -bound, bound),
            "b_hh": jax.random.uniform(k3, (4 * MODEL_SIZE,),
                                       jnp.float32, -bound, bound),
        })

    def make_inputs(k, seq_lengths):
        toks = jax.random.randint(k, (sum(seq_lengths),), 0, DICT_SIZE_1,
                                  jnp.int32)
        out, off = [], 0
        for Lseq in seq_lengths:
            out.append(toks[off:off + Lseq])
            off += Lseq
        return out

    def reference(padded_tokens, lengths_arr):
        x_check = params["embedding"][padded_tokens]
        h_check = c_check = None
        for i in range(NUM_LAYER):
            p = params["layers"][i]
            x_check, h_check, c_check = _ref_lstm_residual_layer(
                x_check, lengths_arr, p["w_ih"], p["w_hh"], p["b_ih"], p["b_hh"])
        return x_check, h_check, c_check

    # ------------------------------------------------------------------ Test A
    # Original small shapes (T=8): bf16-matmul fast path + f32-matmul path,
    # single batch block, fully-unrolled static timestep loop.
    seq_lengths = [8, 5]
    inputs = make_inputs(k_tok, seq_lengths)

    ys, (hx, cx), x_final, padded, lengths_arr = normal_encoder_forward(
        inputs, params, NUM_LAYER, matmul_dtype=jnp.bfloat16)
    jax.block_until_ready((hx, cx, x_final))

    _, (hx32, cx32), x_final32, _, _ = normal_encoder_forward(
        inputs, params, NUM_LAYER, matmul_dtype=jnp.float32)
    jax.block_until_ready((hx32, cx32, x_final32))

    x_check, h_check, c_check = reference(padded, lengths_arr)

    # f32 kernel path: matches reference at tight tolerance
    assert jnp.allclose(x_final32, x_check, atol=2e-3, rtol=2e-3)
    assert jnp.allclose(hx32[0], h_check, atol=2e-3, rtol=2e-3)
    assert jnp.allclose(cx32[0], c_check, atol=2e-3, rtol=2e-3)

    # bf16-matmul kernel path: looser tolerance for bf16 operand rounding
    assert jnp.allclose(x_final, x_check, atol=2e-2, rtol=2e-2)
    assert jnp.allclose(hx[0], h_check, atol=2e-2, rtol=2e-2)
    assert jnp.allclose(cx[0], c_check, atol=2e-2, rtol=2e-2)
    assert all(int(y.shape[0]) == Ls for y, Ls in zip(ys, seq_lengths))

    # ------------------------------------------------------------------ Test B
    # Longer sequences: exercises time chunking (T padded to 2 chunks of 16),
    # the partially-unrolled fori_loop timestep path, and the batch-parallel
    # grid axis (2 blocks — the v7x two-TensorCore path); f32 for tight check.
    seq_lengths_b = [20, 13]
    inputs_b = make_inputs(k_tok_b, seq_lengths_b)

    ys_b, (hxb, cxb), xb_final, padded_b, lengths_b = normal_encoder_forward(
        inputs_b, params, NUM_LAYER, matmul_dtype=jnp.float32,
        t_chunk=16, batch_blocks=2)
    jax.block_until_ready((hxb, cxb, xb_final))

    xb_check, hb_check, cb_check = reference(padded_b, lengths_b)
    assert jnp.allclose(xb_final, xb_check, atol=2e-3, rtol=2e-3)
    assert jnp.allclose(hxb[0], hb_check, atol=2e-3, rtol=2e-3)
    assert jnp.allclose(cxb[0], cb_check, atol=2e-3, rtol=2e-3)
    assert all(int(y.shape[0]) == Ls for y, Ls in zip(ys_b, seq_lengths_b))

    print("KERNEL_OK")
</pallas_src>

<mosaic_0001>
module attributes {stable_mosaic.version = 11 : i64} {
  func.func @_encoder_lstm_stack_kernel(%arg0: i32, %arg1: i32, %arg2: memref<8x16x32xf32, #tpu.memory_space<vmem>>, %arg3: memref<8x16x1xf32, #tpu.memory_space<vmem>>, %arg4: memref<1x32x128xbf16, #tpu.memory_space<vmem>>, %arg5: memref<1x32x128xbf16, #tpu.memory_space<vmem>>, %arg6: memref<1x1x128xf32, #tpu.memory_space<vmem>>, %arg7: memref<8x16x32xf32, #tpu.memory_space<vmem>>, %arg8: memref<16x32xf32, #tpu.memory_space<vmem>>, %arg9: memref<16x32xf32, #tpu.memory_space<vmem>>, %arg10: memref<8x16x128xf32, #tpu.memory_space<vmem>>, %arg11: memref<16x32xf32, #tpu.memory_space<vmem>>, %arg12: memref<16x32xf32, #tpu.memory_space<vmem>>) attributes {dimension_semantics = [#tpu.dimension_semantics<parallel>, #tpu.dimension_semantics<arbitrary>], iteration_bounds = array<i64: 1, 2>, scalar_prefetch = 0 : i64, scratch_operands = 3 : i64, tpu.core_type = #tpu.core_type<tc>, window_params = [{transform_indices = @transform_0, window_bounds = array<i64: 8, 16, 32>}, {transform_indices = @transform_1, window_bounds = array<i64: 8, 16, 1>}, {transform_indices = @transform_2, window_bounds = array<i64: 1, 32, 128>}, {transform_indices = @transform_3, window_bounds = array<i64: 1, 32, 128>}, {transform_indices = @transform_4, window_bounds = array<i64: 1, 1, 128>}, {transform_indices = @transform_5, window_bounds = array<i64: 8, 16, 32>}, {transform_indices = @transform_6, window_bounds = array<i64: 16, 32>}, {transform_indices = @transform_7, window_bounds = array<i64: 16, 32>}]} {
    %c0_i32 = arith.constant 0 : i32
    %0 = arith.cmpi eq, %arg1, %c0_i32 : i32
    %1 = arith.extui %0 : i1 to i32
    %c0_i32_0 = arith.constant 0 : i32
    %2 = arith.cmpi ne, %1, %c0_i32_0 : i32
    scf.if %2 {
      %c0_238 = arith.constant 0 : index
      %c0_239 = arith.constant 0 : index
      %c0_240 = arith.constant 0 : index
      %385 = vector.load %arg2[%c0_238, %c0_239, %c0_240] : memref<8x16x32xf32, #tpu.memory_space<vmem>>, vector<8x16x32xf32>
      %c0_241 = arith.constant 0 : index
      %c0_242 = arith.constant 0 : index
      %c0_243 = arith.constant 0 : index
      %386 = vector.load %arg7[%c0_241, %c0_242, %c0_243] : memref<8x16x32xf32, #tpu.memory_space<vmem>>, vector<8x16x32xf32>
      tpu.vector_store %arg7[%c0_241, %c0_242, %c0_243], %385 {strides = array<i32>} : memref<8x16x32xf32, #tpu.memory_space<vmem>>, vector<8x16x32xf32>,
    } else {
    }
    %c0 = arith.constant 0 : index
    %c0_1 = arith.constant 0 : index
    %c0_2 = arith.constant 0 : index
    %3 = vector.load %arg4[%c0, %c0_1, %c0_2] : memref<1x32x128xbf16, #tpu.memory_space<vmem>>, vector<1x32x128xbf16>
    %4 = vector.shape_cast %3 : vector<1x32x128xbf16> to vector<32x128xbf16>
    %c0_3 = arith.constant 0 : index
    %c0_4 = arith.constant 0 : index
    %c0_5 = arith.constant 0 : index
    %5 = vector.load %arg5[%c0_3, %c0_4, %c0_5] : memref<1x32x128xbf16, #tpu.memory_space<vmem>>, vector<1x32x128xbf16>
    %6 = vector.shape_cast %5 : vector<1x32x128xbf16> to vector<32x128xbf16>
    %c0_6 = arith.constant 0 : index
    %c0_7 = arith.constant 0 : index
    %c0_8 = arith.constant 0 : index
    %7 = vector.load %arg6[%c0_6, %c0_7, %c0_8] : memref<1x1x128xf32, #tpu.memory_space<vmem>>, vector<1x1x128xf32>
    %8 = vector.shape_cast %7 : vector<1x1x128xf32> to vector<1x128xf32>
    %cst = arith.constant 0.000000e+00 : f32
    %9 = vector.broadcast %cst : f32 to vector<16x32xf32>
    %c0_9 = arith.constant 0 : index
    %c0_10 = arith.constant 0 : index
    %10 = vector.load %arg11[%c0_9, %c0_10] : memref<16x32xf32, #tpu.memory_space<vmem>>, vector<16x32xf32>
    tpu.vector_store %arg11[%c0_9, %c0_10], %9 {strides = array<i32>} : memref<16x32xf32, #tpu.memory_space<vmem>>, vector<16x32xf32>,
    %cst_11 = arith.constant 0.000000e+00 : f32
    %11 = vector.broadcast %cst_11 : f32 to vector<16x32xf32>
    %c0_12 = arith.constant 0 : index
    %c0_13 = arith.constant 0 : index
    %12 = vector.load %arg12[%c0_12, %c0_13] : memref<16x32xf32, #tpu.memory_space<vmem>>, vector<16x32xf32>
    tpu.vector_store %arg12[%c0_12, %c0_13], %11 {strides = array<i32>} : memref<16x32xf32, #tpu.memory_space<vmem>>, vector<16x32xf32>,
    %c0_14 = arith.constant 0 : index
    %c0_15 = arith.constant 0 : index
    %c0_16 = arith.constant 0 : index
    %13 = vector.load %arg7[%c0_14, %c0_15, %c0_16] : memref<8x16x32xf32, #tpu.memory_space<vmem>>, vector<8x16x32xf32>
    %14 = vector.shape_cast %13 : vector<8x16x32xf32> to vector<128x32xf32>
    %15 = arith.truncf %14 : vector<128x32xf32> to vector<128x32xbf16>
    %cst_17 = arith.constant dense<0.000000e+00> : vector<128x128xf32>
    %16 = tpu.matmul %15, %4, %cst_17 {dimension_numbers = #tpu.dot_dimension_numbers<[1], [0], [0], [1], [0, 0, 1, 1], [], []>} : vector<128x32xbf16>, vector<32x128xbf16>, vector<128x128xf32> -> vector<128x128xf32>
    %17 = vector.broadcast %8 : vector<1x128xf32> to vector<128x128xf32>
    %18 = arith.addf %16, %17 : vector<128x128xf32>
    %19 = vector.shape_cast %18 : vector<128x128xf32> to vector<8x16x128xf32>
    %c0_18 = arith.constant 0 : index
    %c0_19 = arith.constant 0 : index
    %c0_20 = arith.constant 0 : index
    %20 = vector.load %arg10[%c0_18, %c0_19, %c0_20] : memref<8x16x128xf32, #tpu.memory_space<vmem>>, vector<8x16x128xf32>
    tpu.vector_store %arg10[%c0_18, %c0_19, %c0_20], %19 {strides = array<i32>} : memref<8x16x128xf32, #tpu.memory_space<vmem>>, vector<8x16x128xf32>,
    %c0_21 = arith.constant 0 : index
    %c0_22 = arith.constant 0 : index
    %c0_23 = arith.constant 0 : index
    %21 = vector.load %arg3[%c0_21, %c0_22, %c0_23] : memref<8x16x1xf32, #tpu.memory_space<vmem>>, vector<1x16x1xf32>
    %22 = vector.shape_cast %21 : vector<1x16x1xf32> to vector<16x1xf32>
    %23 = vector.shape_cast %22 : vector<16x1xf32> to vector<16x1xf32>
    %24 = vector.broadcast %23 : vector<16x1xf32> to vector<16x32xf32>
    %cst_24 = arith.constant 1.000000e+00 : f32
    %25 = vector.broadcast %cst_24 : f32 to vector<16x32xf32>
    %26 = arith.subf %25, %24 : vector<16x32xf32>
    %c0_25 = arith.constant 0 : index
    %c0_26 = arith.constant 0 : index
    %c0_27 = arith.constant 0 : index
    %27 = vector.load %arg10[%c0_25, %c0_26, %c0_27] : memref<8x16x128xf32, #tpu.memory_space<vmem>>, vector<1x16x128xf32>
    %28 = vector.shape_cast %27 : vector<1x16x128xf32> to vector<16x128xf32>
    %c0_28 = arith.constant 0 : index
    %c0_29 = arith.constant 0 : index
    %29 = vector.load %arg11[%c0_28, %c0_29] : memref<16x32xf32, #tpu.memory_space<vmem>>, vector<16x32xf32>
    %30 = arith.truncf %29 : vector<16x32xf32> to vector<16x32xbf16>
    %cst_30 = arith.constant dense<0.000000e+00> : vector<16x128xf32>
    %31 = tpu.matmul %30, %6, %cst_30 {dimension_numbers = #tpu.dot_dimension_numbers<[1], [0], [0], [1], [0, 0, 1, 1], [], []>} : vector<16x32xbf16>, vector<32x128xbf16>, vector<16x128xf32> -> vector<16x128xf32>
    %32 = arith.addf %28, %31 : vector<16x128xf32>
    %33 = vector.extract_strided_slice %32 {offsets = [0, 0], sizes = [16, 96], strides = [1, 1]} : vector<16x128xf32> to vector<16x96xf32>
    %34 = arith.negf %33 : vector<16x96xf32>
    %35 = math.exp %34 : vector<16x96xf32>
    %cst_31 = arith.constant 1.000000e+00 : f32
    %36 = vector.broadcast %cst_31 : f32 to vector<16x96xf32>
    %37 = arith.addf %36, %35 : vector<16x96xf32>
    %38 = arith.divf %36, %37 : vector<16x96xf32>
    %39 = vector.extract_strided_slice %38 {offsets = [0, 0], sizes = [16, 32], strides = [1, 1]} : vector<16x96xf32> to vector<16x32xf32>
    %40 = vector.extract_strided_slice %38 {offsets = [0, 32], sizes = [16, 32], strides = [1, 1]} : vector<16x96xf32> to vector<16x32xf32>
    %41 = vector.extract_strided_slice %38 {offsets = [0, 64], sizes = [16, 32], strides = [1, 1]} : vector<16x96xf32> to vector<16x32xf32>
    %42 = vector.extract_strided_slice %32 {offsets = [0, 96], sizes = [16, 32], strides = [1, 1]} : vector<16x128xf32> to vector<16x32xf32>
    %43 = math.tanh %42 : vector<16x32xf32>
    %c0_32 = arith.constant 0 : index
    %c0_33 = arith.constant 0 : index
    %44 = vector.load %arg12[%c0_32, %c0_33] : memref<16x32xf32, #tpu.memory_space<vmem>>, vector<16x32xf32>
    %45 = arith.mulf %40, %44 : vector<16x32xf32>
    %46 = arith.mulf %39, %43 : vector<16x32xf32>
    %47 = arith.addf %45, %46 : vector<16x32xf32>
    %48 = math.tanh %47 : vector<16x32xf32>
    %49 = arith.mulf %41, %48 : vector<16x32xf32>
    %50 = arith.mulf %24, %47 : vector<16x32xf32>
    %c0_34 = arith.constant 0 : index
    %c0_35 = arith.constant 0 : index
    %51 = vector.load %arg12[%c0_34, %c0_35] : memref<16x32xf32, #tpu.memory_space<vmem>>, vector<16x32xf32>
    %52 = arith.mulf %26, %51 : vector<16x32xf32>
    %53 = arith.addf %50, %52 : vector<16x32xf32>
    %c0_36 = arith.constant 0 : index
    %c0_37 = arith.constant 0 : index
    %54 = vector.load %arg12[%c0_36, %c0_37] : memref<16x32xf32, #tpu.memory_space<vmem>>, vector<16x32xf32>
    tpu.vector_store %arg12[%c0_36, %c0_37], %53 {strides = array<i32>} : memref<16x32xf32, #tpu.memory_space<vmem>>, vector<16x32xf32>,
    %55 = arith.mulf %24, %49 : vector<16x32xf32>
    %c0_38 = arith.constant 0 : index
    %c0_39 = arith.constant 0 : index
    %56 = vector.load %arg11[%c0_38, %c0_39] : memref<16x32xf32, #tpu.memory_space<vmem>>, vector<16x32xf32>
    %57 = arith.mulf %26, %56 : vector<16x32xf32>
    %58 = arith.addf %55, %57 : vector<16x32xf32>
    %c0_40 = arith.constant 0 : index
    %c0_41 = arith.constant 0 : index
    %59 = vector.load %arg11[%c0_40, %c0_41] : memref<16x32xf32, #tpu.memory_space<vmem>>, vector<16x32xf32>
    tpu.vector_store %arg11[%c0_40, %c0_41], %58 {strides = array<i32>} : memref<16x32xf32, #tpu.memory_space<vmem>>, vector<16x32xf32>,
    %c0_42 = arith.constant 0 : index
    %c0_43 = arith.constant 0 : index
    %c0_44 = arith.constant 0 : index
    %60 = vector.load %arg7[%c0_42, %c0_43, %c0_44] : memref<8x16x32xf32, #tpu.memory_space<vmem>>, vector<1x16x32xf32>
    %61 = vector.shape_cast %60 : vector<1x16x32xf32> to vector<16x32xf32>
    %62 = arith.mulf %24, %49 : vector<16x32xf32>
    %63 = arith.addf %62, %61 : vector<16x32xf32>
    %64 = vector.shape_cast %63 : vector<16x32xf32> to vector<1x16x32xf32>
    %c0_45 = arith.constant 0 : index
    %c0_46 = arith.constant 0 : index
    %c0_47 = arith.constant 0 : index
    %65 = vector.load %arg7[%c0_45, %c0_46, %c0_47] : memref<8x16x32xf32, #tpu.memory_space<vmem>>, vector<1x16x32xf32>
    tpu.vector_store %arg7[%c0_45, %c0_46, %c0_47], %64 {strides = array<i32>} : memref<8x16x32xf32, #tpu.memory_space<vmem>>, vector<1x16x32xf32>,
    %c1 = arith.constant 1 : index
    %c0_48 = arith.constant 0 : index
    %c0_49 = arith.constant 0 : index
    %66 = vector.load %arg3[%c1, %c0_48, %c0_49] : memref<8x16x1xf32, #tpu.memory_space<vmem>>, vector<1x16x1xf32>
    %67 = vector.shape_cast %66 : vector<1x16x1xf32> to vector<16x1xf32>
    %68 = vector.shape_cast %67 : vector<16x1xf32> to vector<16x1xf32>
    %69 = vector.broadcast %68 : vector<16x1xf32> to vector<16x32xf32>
    %cst_50 = arith.constant 1.000000e+00 : f32
    %70 = vector.broadcast %cst_50 : f32 to vector<16x32xf32>
    %71 = arith.subf %70, %69 : vector<16x32xf32>
    %c1_51 = arith.constant 1 : index
    %c0_52 = arith.constant 0 : index
    %c0_53 = arith.constant 0 : index
    %72 = vector.load %arg10[%c1_51, %c0_52, %c0_53] : memref<8x16x128xf32, #tpu.memory_space<vmem>>, vector<1x16x128xf32>
    %73 = vector.shape_cast %72 : vector<1x16x128xf32> to vector<16x128xf32>
    %c0_54 = arith.constant 0 : index
    %c0_55 = arith.constant 0 : index
    %74 = vector.load %arg11[%c0_54, %c0_55] : memref<16x32xf32, #tpu.memory_space<vmem>>, vector<16x32xf32>
    %75 = arith.truncf %74 : vector<16x32xf32> to vector<16x32xbf16>
    %cst_56 = arith.constant dense<0.000000e+00> : vector<16x128xf32>
    %76 = tpu.matmul %75, %6, %cst_56 {dimension_numbers = #tpu.dot_dimension_numbers<[1], [0], [0], [1], [0, 0, 1, 1], [], []>} : vector<16x32xbf16>, vector<32x128xbf16>, vector<16x128xf32> -> vector<16x128xf32>
    %77 = arith.addf %73, %76 : vector<16x128xf32>
    %78 = vector.extract_strided_slice %77 {offsets = [0, 0], sizes = [16, 96], strides = [1, 1]} : vector<16x128xf32> to vector<16x96xf32>
    %79 = arith.negf %78 : vector<16x96xf32>
    %80 = math.exp %79 : vector<16x96xf32>
    %cst_57 = arith.constant 1.000000e+00 : f32
    %81 = vector.broadcast %cst_57 : f32 to vector<16x96xf32>
    %82 = arith.addf %81, %80 : vector<16x96xf32>
    %83 = arith.divf %81, %82 : vector<16x96xf32>
    %84 = vector.extract_strided_slice %83 {offsets = [0, 0], sizes = [16, 32], strides = [1, 1]} : vector<16x96xf32> to vector<16x32xf32>
    %85 = vector.extract_strided_slice %83 {offsets = [0, 32], sizes = [16, 32], strides = [1, 1]} : vector<16x96xf32> to vector<16x32xf32>
    %86 = vector.extract_strided_slice %83 {offsets = [0, 64], sizes = [16, 32], strides = [1, 1]} : vector<16x96xf32> to vector<16x32xf32>
    %87 = vector.extract_strided_slice %77 {offsets = [0, 96], sizes = [16, 32], strides = [1, 1]} : vector<16x128xf32> to vector<16x32xf32>
    %88 = math.tanh %87 : vector<16x32xf32>
    %c0_58 = arith.constant 0 : index
    %c0_59 = arith.constant 0 : index
    %89 = vector.load %arg12[%c0_58, %c0_59] : memref<16x32xf32, #tpu.memory_space<vmem>>, vector<16x32xf32>
    %90 = arith.mulf %85, %89 : vector<16x32xf32>
    %91 = arith.mulf %84, %88 : vector<16x32xf32>
    %92 = arith.addf %90, %91 : vector<16x32xf32>
    %93 = math.tanh %92 : vector<16x32xf32>
    %94 = arith.mulf %86, %93 : vector<16x32xf32>
    %95 = arith.mulf %69, %92 : vector<16x32xf32>
    %c0_60 = arith.constant 0 : index
    %c0_61 = arith.constant 0 : index
    %96 = vector.load %arg12[%c0_60, %c0_61] : memref<16x32xf32, #tpu.memory_space<vmem>>, vector<16x32xf32>
    %97 = arith.mulf %71, %96 : vector<16x32xf32>
    %98 = arith.addf %95, %97 : vector<16x32xf32>
    %c0_62 = arith.constant 0 : index
    %c0_63 = arith.constant 0 : index
    %99 = vector.load %arg12[%c0_62, %c0_63] : memref<16x32xf32, #tpu.memory_space<vmem>>, vector<16x32xf32>
    tpu.vector_store %arg12[%c0_62, %c0_63], %98 {strides = array<i32>} : memref<16x32xf32, #tpu.memory_space<vmem>>, vector<16x32xf32>,
    %100 = arith.mulf %69, %94 : vector<16x32xf32>
    %c0_64 = arith.constant 0 : index
    %c0_65 = arith.constant 0 : index
    %101 = vector.load %arg11[%c0_64, %c0_65] : memref<16x32xf32, #tpu.memory_space<vmem>>, vector<16x32xf32>
    %102 = arith.mulf %71, %101 : vector<16x32xf32>
    %103 = arith.addf %100, %102 : vector<16x32xf32>
    %c0_66 = arith.constant 0 : index
    %c0_67 = arith.constant 0 : index
    %104 = vector.load %arg11[%c0_66, %c0_67] : memref<16x32xf32, #tpu.memory_space<vmem>>, vector<16x32xf32>
    tpu.vector_store %arg11[%c0_66, %c0_67], %103 {strides = array<i32>} : memref<16x32xf32, #tpu.memory_space<vmem>>, vector<16x32xf32>,
    %c1_68 = arith.constant 1 : index
    %c0_69 = arith.constant 0 : index
    %c0_70 = arith.constant 0 : index
    %105 = vector.load %arg7[%c1_68, %c0_69, %c0_70] : memref<8x16x32xf32, #tpu.memory_space<vmem>>, vector<1x16x32xf32>
    %106 = vector.shape_cast %105 : vector<1x16x32xf32> to vector<16x32xf32>
    %107 = arith.mulf %69, %94 : vector<16x32xf32>
    %108 = arith.addf %107, %106 : vector<16x32xf32>
    %109 = vector.shape_cast %108 : vector<16x32xf32> to vector<1x16x32xf32>
    %c1_71 = arith.constant 1 : index
    %c0_72 = arith.constant 0 : index
    %c0_73 = arith.constant 0 : index
    %110 = vector.load %arg7[%c1_71, %c0_72, %c0_73] : memref<8x16x32xf32, #tpu.memory_space<vmem>>, vector<1x16x32xf32>
    tpu.vector_store %arg7[%c1_71, %c0_72, %c0_73], %109 {strides = array<i32>} : memref<8x16x32xf32, #tpu.memory_space<vmem>>, vector<1x16x32xf32>,
    %c2 = arith.constant 2 : index
    %c0_74 = arith.constant 0 : index
    %c0_75 = arith.constant 0 : index
    %111 = vector.load %arg3[%c2, %c0_74, %c0_75] : memref<8x16x1xf32, #tpu.memory_space<vmem>>, vector<1x16x1xf32>
    %112 = vector.shape_cast %111 : vector<1x16x1xf32> to vector<16x1xf32>
    %113 = vector.shape_cast %112 : vector<16x1xf32> to vector<16x1xf32>
    %114 = vector.broadcast %113 : vector<16x1xf32> to vector<16x32xf32>
    %cst_76 = arith.constant 1.000000e+00 : f32
    %115 = vector.broadcast %cst_76 : f32 to vector<16x32xf32>
    %116 = arith.subf %115, %114 : vector<16x32xf32>
    %c2_77 = arith.constant 2 : index
    %c0_78 = arith.constant 0 : index
    %c0_79 = arith.constant 0 : index
    %117 = vector.load %arg10[%c2_77, %c0_78, %c0_79] : memref<8x16x128xf32, #tpu.memory_space<vmem>>, vector<1x16x128xf32>
    %118 = vector.shape_cast %117 : vector<1x16x128xf32> to vector<16x128xf32>
    %c0_80 = arith.constant 0 : index
    %c0_81 = arith.constant 0 : index
    %119 = vector.load %arg11[%c0_80, %c0_81] : memref<16x32xf32, #tpu.memory_space<vmem>>, vector<16x32xf32>
    %120 = arith.truncf %119 : vector<16x32xf32> to vector<16x32xbf16>
    %cst_82 = arith.constant dense<0.000000e+00> : vector<16x128xf32>
    %121 = tpu.matmul %120, %6, %cst_82 {dimension_numbers = #tpu.dot_dimension_numbers<[1], [0], [0], [1], [0, 0, 1, 1], [], []>} : vector<16x32xbf16>, vector<32x128xbf16>, vector<16x128xf32> -> vector<16x128xf32>
    %122 = arith.addf %118, %121 : vector<16x128xf32>
    %123 = vector.extract_strided_slice %122 {offsets = [0, 0], sizes = [16, 96], strides = [1, 1]} : vector<16x128xf32> to vector<16x96xf32>
    %124 = arith.negf %123 : vector<16x96xf32>
    %125 = math.exp %124 : vector<16x96xf32>
    %cst_83 = arith.constant 1.000000e+00 : f32
    %126 = vector.broadcast %cst_83 : f32 to vector<16x96xf32>
    %127 = arith.addf %126, %125 : vector<16x96xf32>
    %128 = arith.divf %126, %127 : vector<16x96xf32>
    %129 = vector.extract_strided_slice %128 {offsets = [0, 0], sizes = [16, 32], strides = [1, 1]} : vector<16x96xf32> to vector<16x32xf32>
    %130 = vector.extract_strided_slice %128 {offsets = [0, 32], sizes = [16, 32], strides = [1, 1]} : vector<16x96xf32> to vector<16x32xf32>
    %131 = vector.extract_strided_slice %128 {offsets = [0, 64], sizes = [16, 32], strides = [1, 1]} : vector<16x96xf32> to vector<16x32xf32>
    %132 = vector.extract_strided_slice %122 {offsets = [0, 96], sizes = [16, 32], strides = [1, 1]} : vector<16x128xf32> to vector<16x32xf32>
    %133 = math.tanh %132 : vector<16x32xf32>
    %c0_84 = arith.constant 0 : index
    %c0_85 = arith.constant 0 : index
    %134 = vector.load %arg12[%c0_84, %c0_85] : memref<16x32xf32, #tpu.memory_space<vmem>>, vector<16x32xf32>
    %135 = arith.mulf %130, %134 : vector<16x32xf32>
    %136 = arith.mulf %129, %133 : vector<16x32xf32>
    %137 = arith.addf %135, %136 : vector<16x32xf32>
    %138 = math.tanh %137 : vector<16x32xf32>
    %139 = arith.mulf %131, %138 : vector<16x32xf32>
    %140 = arith.mulf %114, %137 : vector<16x32xf32>
    %c0_86 = arith.constant 0 : index
    %c0_87 = arith.constant 0 : index
    %141 = vector.load %arg12[%c0_86, %c0_87] : memref<16x32xf32, #tpu.memory_space<vmem>>, vector<16x32xf32>
    %142 = arith.mulf %116, %141 : vector<16x32xf32>
    %143 = arith.addf %140, %142 : vector<16x32xf32>
    %c0_88 = arith.constant 0 : index
    %c0_89 = arith.constant 0 : index
    %144 = vector.load %arg12[%c0_88, %c0_89] : memref<16x32xf32, #tpu.memory_space<vmem>>, vector<16x32xf32>
    tpu.vector_store %arg12[%c0_88, %c0_89], %143 {strides = array<i32>} : memref<16x32xf32, #tpu.memory_space<vmem>>, vector<16x32xf32>,
    %145 = arith.mulf %114, %139 : vector<16x32xf32>
    %c0_90 = arith.constant 0 : index
    %c0_91 = arith.constant 0 : index
    %146 = vector.load %arg11[%c0_90, %c0_91] : memref<16x32xf32, #tpu.memory_space<vmem>>, vector<16x32xf32>
    %147 = arith.mulf %116, %146 : vector<16x32xf32>
    %148 = arith.addf %145, %147 : vector<16x32xf32>
    %c0_92 = arith.constant 0 : index
    %c0_93 = arith.constant 0 : index
    %149 = vector.load %arg11[%c0_92, %c0_93] : memref<16x32xf32, #tpu.memory_space<vmem>>, vector<16x32xf32>
    tpu.vector_store %arg11[%c0_92, %c0_93], %148 {strides = array<i32>} : memref<16x32xf32, #tpu.memory_space<vmem>>, vector<16x32xf32>,
    %c2_94 = arith.constant 2 : index
    %c0_95 = arith.constant 0 : index
    %c0_96 = arith.constant 0 : index
    %150 = vector.load %arg7[%c2_94, %c0_95, %c0_96] : memref<8x16x32xf32, #tpu.memory_space<vmem>>, vector<1x16x32xf32>
    %151 = vector.shape_cast %150 : vector<1x16x32xf32> to vector<16x32xf32>
    %152 = arith.mulf %114, %139 : vector<16x32xf32>
    %153 = arith.addf %152, %151 : vector<16x32xf32>
    %154 = vector.shape_cast %153 : vector<16x32xf32> to vector<1x16x32xf32>
    %c2_97 = arith.constant 2 : index
    %c0_98 = arith.constant 0 : index
    %c0_99 = arith.constant 0 : index
    %155 = vector.load %arg7[%c2_97, %c0_98, %c0_99] : memref<8x16x32xf32, #tpu.memory_space<vmem>>, vector<1x16x32xf32>
    tpu.vector_store %arg7[%c2_97, %c0_98, %c0_99], %154 {strides = array<i32>} : memref<8x16x32xf32, #tpu.memory_space<vmem>>, vector<1x16x32xf32>,
    %c3 = arith.constant 3 : index
    %c0_100 = arith.constant 0 : index
    %c0_101 = arith.constant 0 : index
    %156 = vector.load %arg3[%c3, %c0_100, %c0_101] : memref<8x16x1xf32, #tpu.memory_space<vmem>>, vector<1x16x1xf32>
    %157 = vector.shape_cast %156 : vector<1x16x1xf32> to vector<16x1xf32>
    %158 = vector.shape_cast %157 : vector<16x1xf32> to vector<16x1xf32>
    %159 = vector.broadcast %158 : vector<16x1xf32> to vector<16x32xf32>
    %cst_102 = arith.constant 1.000000e+00 : f32
    %160 = vector.broadcast %cst_102 : f32 to vector<16x32xf32>
    %161 = arith.subf %160, %159 : vector<16x32xf32>
    %c3_103 = arith.constant 3 : index
    %c0_104 = arith.constant 0 : index
    %c0_105 = arith.constant 0 : index
    %162 = vector.load %arg10[%c3_103, %c0_104, %c0_105] : memref<8x16x128xf32, #tpu.memory_space<vmem>>, vector<1x16x128xf32>
    %163 = vector.shape_cast %162 : vector<1x16x128xf32> to vector<16x128xf32>
    %c0_106 = arith.constant 0 : index
    %c0_107 = arith.constant 0 : index
    %164 = vector.load %arg11[%c0_106, %c0_107] : memref<16x32xf32, #tpu.memory_space<vmem>>, vector<16x32xf32>
    %165 = arith.truncf %164 : vector<16x32xf32> to vector<16x32xbf16>
    %cst_108 = arith.constant dense<0.000000e+00> : vector<16x128xf32>
    %166 = tpu.matmul %165, %6, %cst_108 {dimension_numbers = #tpu.dot_dimension_numbers<[1], [0], [0], [1], [0, 0, 1, 1], [], []>} : vector<16x32xbf16>, vector<32x128xbf16>, vector<16x128xf32> -> vector<16x128xf32>
    %167 = arith.addf %163, %166 : vector<16x128xf32>
    %168 = vector.extract_strided_slice %167 {offsets = [0, 0], sizes = [16, 96], strides = [1, 1]} : vector<16x128xf32> to vector<16x96xf32>
    %169 = arith.negf %168 : vector<16x96xf32>
    %170 = math.exp %169 : vector<16x96xf32>
    %cst_109 = arith.constant 1.000000e+00 : f32
    %171 = vector.broadcast %cst_109 : f32 to vector<16x96xf32>
    %172 = arith.addf %171, %170 : vector<16x96xf32>
    %173 = arith.divf %171, %172 : vector<16x96xf32>
    %174 = vector.extract_strided_slice %173 {offsets = [0, 0], sizes = [16, 32], strides = [1, 1]} : vector<16x96xf32> to vector<16x32xf32>
    %175 = vector.extract_strided_slice %173 {offsets = [0, 32], sizes = [16, 32], strides = [1, 1]} : vector<16x96xf32> to vector<16x32xf32>
    %176 = vector.extract_strided_slice %173 {offsets = [0, 64], sizes = [16, 32], strides = [1, 1]} : vector<16x96xf32> to vector<16x32xf32>
    %177 = vector.extract_strided_slice %167 {offsets = [0, 96], sizes = [16, 32], strides = [1, 1]} : vector<16x128xf32> to vector<16x32xf32>
    %178 = math.tanh %177 : vector<16x32xf32>
    %c0_110 = arith.constant 0 : index
    %c0_111 = arith.constant 0 : index
    %179 = vector.load %arg12[%c0_110, %c0_111] : memref<16x32xf32, #tpu.memory_space<vmem>>, vector<16x32xf32>
    %180 = arith.mulf %175, %179 : vector<16x32xf32>
    %181 = arith.mulf %174, %178 : vector<16x32xf32>
    %182 = arith.addf %180, %181 : vector<16x32xf32>
    %183 = math.tanh %182 : vector<16x32xf32>
    %184 = arith.mulf %176, %183 : vector<16x32xf32>
    %185 = arith.mulf %159, %182 : vector<16x32xf32>
    %c0_112 = arith.constant 0 : index
    %c0_113 = arith.constant 0 : index
    %186 = vector.load %arg12[%c0_112, %c0_113] : memref<16x32xf32, #tpu.memory_space<vmem>>, vector<16x32xf32>
    %187 = arith.mulf %161, %186 : vector<16x32xf32>
    %188 = arith.addf %185, %187 : vector<16x32xf32>
    %c0_114 = arith.constant 0 : index
    %c0_115 = arith.constant 0 : index
    %189 = vector.load %arg12[%c0_114, %c0_115] : memref<16x32xf32, #tpu.memory_space<vmem>>, vector<16x32xf32>
    tpu.vector_store %arg12[%c0_114, %c0_115], %188 {strides = array<i32>} : memref<16x32xf32, #tpu.memory_space<vmem>>, vector<16x32xf32>,
    %190 = arith.mulf %159, %184 : vector<16x32xf32>
    %c0_116 = arith.constant 0 : index
    %c0_117 = arith.constant 0 : index
    %191 = vector.load %arg11[%c0_116, %c0_117] : memref<16x32xf32, #tpu.memory_space<vmem>>, vector<16x32xf32>
    %192 = arith.mulf %161, %191 : vector<16x32xf32>
    %193 = arith.addf %190, %192 : vector<16x32xf32>
    %c0_118 = arith.constant 0 : index
    %c0_119 = arith.constant 0 : index
    %194 = vector.load %arg11[%c0_118, %c0_119] : memref<16x32xf32, #tpu.memory_space<vmem>>, vector<16x32xf32>
    tpu.vector_store %arg11[%c0_118, %c0_119], %193 {strides = array<i32>} : memref<16x32xf32, #tpu.memory_space<vmem>>, vector<16x32xf32>,
    %c3_120 = arith.constant 3 : index
    %c0_121 = arith.constant 0 : index
    %c0_122 = arith.constant 0 : index
    %195 = vector.load %arg7[%c3_120, %c0_121, %c0_122] : memref<8x16x32xf32, #tpu.memory_space<vmem>>, vector<1x16x32xf32>
    %196 = vector.shape_cast %195 : vector<1x16x32xf32> to vector<16x32xf32>
    %197 = arith.mulf %159, %184 : vector<16x32xf32>
    %198 = arith.addf %197, %196 : vector<16x32xf32>
    %199 = vector.shape_cast %198 : vector<16x32xf32> to vector<1x16x32xf32>
    %c3_123 = arith.constant 3 : index
    %c0_124 = arith.constant 0 : index
    %c0_125 = arith.constant 0 : index
    %200 = vector.load %arg7[%c3_123, %c0_124, %c0_125] : memref<8x16x32xf32, #tpu.memory_space<vmem>>, vector<1x16x32xf32>
    tpu.vector_store %arg7[%c3_123, %c0_124, %c0_125], %199 {strides = array<i32>} : memref<8x16x32xf32, #tpu.memory_space<vmem>>, vector<1x16x32xf32>,
    %c4 = arith.constant 4 : index
    %c0_126 = arith.constant 0 : index
    %c0_127 = arith.constant 0 : index
    %201 = vector.load %arg3[%c4, %c0_126, %c0_127] : memref<8x16x1xf32, #tpu.memory_space<vmem>>, vector<1x16x1xf32>
    %202 = vector.shape_cast %201 : vector<1x16x1xf32> to vector<16x1xf32>
    %203 = vector.shape_cast %202 : vector<16x1xf32> to vector<16x1xf32>
    %204 = vector.broadcast %203 : vector<16x1xf32> to vector<16x32xf32>
    %cst_128 = arith.constant 1.000000e+00 : f32
    %205 = vector.broadcast %cst_128 : f32 to vector<16x32xf32>
    %206 = arith.subf %205, %204 : vector<16x32xf32>
    %c4_129 = arith.constant 4 : index
    %c0_130 = arith.constant 0 : index
    %c0_131 = arith.constant 0 : index
    %207 = vector.load %arg10[%c4_129, %c0_130, %c0_131] : memref<8x16x128xf32, #tpu.memory_space<vmem>>, vector<1x16x128xf32>
    %208 = vector.shape_cast %207 : vector<1x16x128xf32> to vector<16x128xf32>
    %c0_132 = arith.constant 0 : index
    %c0_133 = arith.constant 0 : index
    %209 = vector.load %arg11[%c0_132, %c0_133] : memref<16x32xf32, #tpu.memory_space<vmem>>, vector<16x32xf32>
    %210 = arith.truncf %209 : vector<16x32xf32> to vector<16x32xbf16>
    %cst_134 = arith.constant dense<0.000000e+00> : vector<16x128xf32>
    %211 = tpu.matmul %210, %6, %cst_134 {dimension_numbers = #tpu.dot_dimension_numbers<[1], [0], [0], [1], [0, 0, 1, 1], [], []>} : vector<16x32xbf16>, vector<32x128xbf16>, vector<16x128xf32> -> vector<16x128xf32>
    %212 = arith.addf %208, %211 : vector<16x128xf32>
    %213 = vector.extract_strided_slice %212 {offsets = [0, 0], sizes = [16, 96], strides = [1, 1]} : vector<16x128xf32> to vector<16x96xf32>
    %214 = arith.negf %213 : vector<16x96xf32>
    %215 = math.exp %214 : vector<16x96xf32>
    %cst_135 = arith.constant 1.000000e+00 : f32
    %216 = vector.broadcast %cst_135 : f32 to vector<16x96xf32>
    %217 = arith.addf %216, %215 : vector<16x96xf32>
    %218 = arith.divf %216, %217 : vector<16x96xf32>
    %219 = vector.extract_strided_slice %218 {offsets = [0, 0], sizes = [16, 32], strides = [1, 1]} : vector<16x96xf32> to vector<16x32xf32>
    %220 = vector.extract_strided_slice %218 {offsets = [0, 32], sizes = [16, 32], strides = [1, 1]} : vector<16x96xf32> to vector<16x32xf32>
    %221 = vector.extract_strided_slice %218 {offsets = [0, 64], sizes = [16, 32], strides = [1, 1]} : vector<16x96xf32> to vector<16x32xf32>
    %222 = vector.extract_strided_slice %212 {offsets = [0, 96], sizes = [16, 32], strides = [1, 1]} : vector<16x128xf32> to vector<16x32xf32>
    %223 = math.tanh %222 : vector<16x32xf32>
    %c0_136 = arith.constant 0 : index
    %c0_137 = arith.constant 0 : index
    %224 = vector.load %arg12[%c0_136, %c0_137] : memref<16x32xf32, #tpu.memory_space<vmem>>, vector<16x32xf32>
    %225 = arith.mulf %220, %224 : vector<16x32xf32>
    %226 = arith.mulf %219, %223 : vector<16x32xf32>
    %227 = arith.addf %225, %226 : vector<16x32xf32>
    %228 = math.tanh %227 : vector<16x32xf32>
    %229 = arith.mulf %221, %228 : vector<16x32xf32>
    %230 = arith.mulf %204, %227 : vector<16x32xf32>
    %c0_138 = arith.constant 0 : index
    %c0_139 = arith.constant 0 : index
    %231 = vector.load %arg12[%c0_138, %c0_139] : memref<16x32xf32, #tpu.memory_space<vmem>>, vector<16x32xf32>
    %232 = arith.mulf %206, %231 : vector<16x32xf32>
    %233 = arith.addf %230, %232 : vector<16x32xf32>
    %c0_140 = arith.constant 0 : index
    %c0_141 = arith.constant 0 : index
    %234 = vector.load %arg12[%c0_140, %c0_141] : memref<16x32xf32, #tpu.memory_space<vmem>>, vector<16x32xf32>
    tpu.vector_store %arg12[%c0_140, %c0_141], %233 {strides = array<i32>} : memref<16x32xf32, #tpu.memory_space<vmem>>, vector<16x32xf32>,
    %235 = arith.mulf %204, %229 : vector<16x32xf32>
    %c0_142 = arith.constant 0 : index
    %c0_143 = arith.constant 0 : index
    %236 = vector.load %arg11[%c0_142, %c0_143] : memref<16x32xf32, #tpu.memory_space<vmem>>, vector<16x32xf32>
    %237 = arith.mulf %206, %236 : vector<16x32xf32>
    %238 = arith.addf %235, %237 : vector<16x32xf32>
    %c0_144 = arith.constant 0 : index
    %c0_145 = arith.constant 0 : index
    %239 = vector.load %arg11[%c0_144, %c0_145] : memref<16x32xf32, #tpu.memory_space<vmem>>, vector<16x32xf32>
    tpu.vector_store %arg11[%c0_144, %c0_145], %238 {strides = array<i32>} : memref<16x32xf32, #tpu.memory_space<vmem>>, vector<16x32xf32>,
    %c4_146 = arith.constant 4 : index
    %c0_147 = arith.constant 0 : index
    %c0_148 = arith.constant 0 : index
    %240 = vector.load %arg7[%c4_146, %c0_147, %c0_148] : memref<8x16x32xf32, #tpu.memory_space<vmem>>, vector<1x16x32xf32>
    %241 = vector.shape_cast %240 : vector<1x16x32xf32> to vector<16x32xf32>
    %242 = arith.mulf %204, %229 : vector<16x32xf32>
    %243 = arith.addf %242, %241 : vector<16x32xf32>
    %244 = vector.shape_cast %243 : vector<16x32xf32> to vector<1x16x32xf32>
    %c4_149 = arith.constant 4 : index
    %c0_150 = arith.constant 0 : index
    %c0_151 = arith.constant 0 : index
    %245 = vector.load %arg7[%c4_149, %c0_150, %c0_151] : memref<8x16x32xf32, #tpu.memory_space<vmem>>, vector<1x16x32xf32>
    tpu.vector_store %arg7[%c4_149, %c0_150, %c0_151], %244 {strides = array<i32>} : memref<8x16x32xf32, #tpu.memory_space<vmem>>, vector<1x16x32xf32>,
    %c5 = arith.constant 5 : index
    %c0_152 = arith.constant 0 : index
    %c0_153 = arith.constant 0 : index
    %246 = vector.load %arg3[%c5, %c0_152, %c0_153] : memref<8x16x1xf32, #tpu.memory_space<vmem>>, vector<1x16x1xf32>
    %247 = vector.shape_cast %246 : vector<1x16x1xf32> to vector<16x1xf32>
    %248 = vector.shape_cast %247 : vector<16x1xf32> to vector<16x1xf32>
    %249 = vector.broadcast %248 : vector<16x1xf32> to vector<16x32xf32>
    %cst_154 = arith.constant 1.000000e+00 : f32
    %250 = vector.broadcast %cst_154 : f32 to vector<16x32xf32>
    %251 = arith.subf %250, %249 : vector<16x32xf32>
    %c5_155 = arith.constant 5 : index
    %c0_156 = arith.constant 0 : index
    %c0_157 = arith.constant 0 : index
    %252 = vector.load %arg10[%c5_155, %c0_156, %c0_157] : memref<8x16x128xf32, #tpu.memory_space<vmem>>, vector<1x16x128xf32>
    %253 = vector.shape_cast %252 : vector<1x16x128xf32> to vector<16x128xf32>
    %c0_158 = arith.constant 0 : index
    %c0_159 = arith.constant 0 : index
    %254 = vector.load %arg11[%c0_158, %c0_159] : memref<16x32xf32, #tpu.memory_space<vmem>>, vector<16x32xf32>
    %255 = arith.truncf %254 : vector<16x32xf32> to vector<16x32xbf16>
    %cst_160 = arith.constant dense<0.000000e+00> : vector<16x128xf32>
    %256 = tpu.matmul %255, %6, %cst_160 {dimension_numbers = #tpu.dot_dimension_numbers<[1], [0], [0], [1], [0, 0, 1, 1], [], []>} : vector<16x32xbf16>, vector<32x128xbf16>, vector<16x128xf32> -> vector<16x128xf32>
    %257 = arith.addf %253, %256 : vector<16x128xf32>
    %258 = vector.extract_strided_slice %257 {offsets = [0, 0], sizes = [16, 96], strides = [1, 1]} : vector<16x128xf32> to vector<16x96xf32>
    %259 = arith.negf %258 : vector<16x96xf32>
    %260 = math.exp %259 : vector<16x96xf32>
    %cst_161 = arith.constant 1.000000e+00 : f32
    %261 = vector.broadcast %cst_161 : f32 to vector<16x96xf32>
    %262 = arith.addf %261, %260 : vector<16x96xf32>
    %263 = arith.divf %261, %262 : vector<16x96xf32>
    %264 = vector.extract_strided_slice %263 {offsets = [0, 0], sizes = [16, 32], strides = [1, 1]} : vector<16x96xf32> to vector<16x32xf32>
    %265 = vector.extract_strided_slice %263 {offsets = [0, 32], sizes = [16, 32], strides = [1, 1]} : vector<16x96xf32> to vector<16x32xf32>
    %266 = vector.extract_strided_slice %263 {offsets = [0, 64], sizes = [16, 32], strides = [1, 1]} : vector<16x96xf32> to vector<16x32xf32>
    %267 = vector.extract_strided_slice %257 {offsets = [0, 96], sizes = [16, 32], strides = [1, 1]} : vector<16x128xf32> to vector<16x32xf32>
    %268 = math.tanh %267 : vector<16x32xf32>
    %c0_162 = arith.constant 0 : index
    %c0_163 = arith.constant 0 : index
    %269 = vector.load %arg12[%c0_162, %c0_163] : memref<16x32xf32, #tpu.memory_space<vmem>>, vector<16x32xf32>
    %270 = arith.mulf %265, %269 : vector<16x32xf32>
    %271 = arith.mulf %264, %268 : vector<16x32xf32>
    %272 = arith.addf %270, %271 : vector<16x32xf32>
    %273 = math.tanh %272 : vector<16x32xf32>
    %274 = arith.mulf %266, %273 : vector<16x32xf32>
    %275 = arith.mulf %249, %272 : vector<16x32xf32>
    %c0_164 = arith.constant 0 : index
    %c0_165 = arith.constant 0 : index
    %276 = vector.load %arg12[%c0_164, %c0_165] : memref<16x32xf32, #tpu.memory_space<vmem>>, vector<16x32xf32>
    %277 = arith.mulf %251, %276 : vector<16x32xf32>
    %278 = arith.addf %275, %277 : vector<16x32xf32>
    %c0_166 = arith.constant 0 : index
    %c0_167 = arith.constant 0 : index
    %279 = vector.load %arg12[%c0_166, %c0_167] : memref<16x32xf32, #tpu.memory_space<vmem>>, vector<16x32xf32>
    tpu.vector_store %arg12[%c0_166, %c0_167], %278 {strides = array<i32>} : memref<16x32xf32, #tpu.memory_space<vmem>>, vector<16x32xf32>,
    %280 = arith.mulf %249, %274 : vector<16x32xf32>
    %c0_168 = arith.constant 0 : index
    %c0_169 = arith.constant 0 : index
    %281 = vector.load %arg11[%c0_168, %c0_169] : memref<16x32xf32, #tpu.memory_space<vmem>>, vector<16x32xf32>
    %282 = arith.mulf %251, %281 : vector<16x32xf32>
    %283 = arith.addf %280, %282 : vector<16x32xf32>
    %c0_170 = arith.constant 0 : index
    %c0_171 = arith.constant 0 : index
    %284 = vector.load %arg11[%c0_170, %c0_171] : memref<16x32xf32, #tpu.memory_space<vmem>>, vector<16x32xf32>
    tpu.vector_store %arg11[%c0_170, %c0_171], %283 {strides = array<i32>} : memref<16x32xf32, #tpu.memory_space<vmem>>, vector<16x32xf32>,
    %c5_172 = arith.constant 5 : index
    %c0_173 = arith.constant 0 : index
    %c0_174 = arith.constant 0 : index
    %285 = vector.load %arg7[%c5_172, %c0_173, %c0_174] : memref<8x16x32xf32, #tpu.memory_space<vmem>>, vector<1x16x32xf32>
    %286 = vector.shape_cast %285 : vector<1x16x32xf32> to vector<16x32xf32>
    %287 = arith.mulf %249, %274 : vector<16x32xf32>
    %288 = arith.addf %287, %286 : vector<16x32xf32>
    %289 = vector.shape_cast %288 : vector<16x32xf32> to vector<1x16x32xf32>
    %c5_175 = arith.constant 5 : index
    %c0_176 = arith.constant 0 : index
    %c0_177 = arith.constant 0 : index
    %290 = vector.load %arg7[%c5_175, %c0_176, %c0_177] : memref<8x16x32xf32, #tpu.memory_space<vmem>>, vector<1x16x32xf32>
    tpu.vector_store %arg7[%c5_175, %c0_176, %c0_177], %289 {strides = array<i32>} : memref<8x16x32xf32, #tpu.memory_space<vmem>>, vector<1x16x32xf32>,
    %c6 = arith.constant 6 : index
    %c0_178 = arith.constant 0 : index
    %c0_179 = arith.constant 0 : index
    %291 = vector.load %arg3[%c6, %c0_178, %c0_179] : memref<8x16x1xf32, #tpu.memory_space<vmem>>, vector<1x16x1xf32>
    %292 = vector.shape_cast %291 : vector<1x16x1xf32> to vector<16x1xf32>
    %293 = vector.shape_cast %292 : vector<16x1xf32> to vector<16x1xf32>
    %294 = vector.broadcast %293 : vector<16x1xf32> to vector<16x32xf32>
    %cst_180 = arith.constant 1.000000e+00 : f32
    %295 = vector.broadcast %cst_180 : f32 to vector<16x32xf32>
    %296 = arith.subf %295, %294 : vector<16x32xf32>
    %c6_181 = arith.constant 6 : index
    %c0_182 = arith.constant 0 : index
    %c0_183 = arith.constant 0 : index
    %297 = vector.load %arg10[%c6_181, %c0_182, %c0_183] : memref<8x16x128xf32, #tpu.memory_space<vmem>>, vector<1x16x128xf32>
    %298 = vector.shape_cast %297 : vector<1x16x128xf32> to vector<16x128xf32>
    %c0_184 = arith.constant 0 : index
    %c0_185 = arith.constant 0 : index
    %299 = vector.load %arg11[%c0_184, %c0_185] : memref<16x32xf32, #tpu.memory_space<vmem>>, vector<16x32xf32>
    %300 = arith.truncf %299 : vector<16x32xf32> to vector<16x32xbf16>
    %cst_186 = arith.constant dense<0.000000e+00> : vector<16x128xf32>
    %301 = tpu.matmul %300, %6, %cst_186 {dimension_numbers = #tpu.dot_dimension_numbers<[1], [0], [0], [1], [0, 0, 1, 1], [], []>} : vector<16x32xbf16>, vector<32x128xbf16>, vector<16x128xf32> -> vector<16x128xf32>
    %302 = arith.addf %298, %301 : vector<16x128xf32>
    %303 = vector.extract_strided_slice %302 {offsets = [0, 0], sizes = [16, 96], strides = [1, 1]} : vector<16x128xf32> to vector<16x96xf32>
    %304 = arith.negf %303 : vector<16x96xf32>
    %305 = math.exp %304 : vector<16x96xf32>
    %cst_187 = arith.constant 1.000000e+00 : f32
    %306 = vector.broadcast %cst_187 : f32 to vector<16x96xf32>
    %307 = arith.addf %306, %305 : vector<16x96xf32>
    %308 = arith.divf %306, %307 : vector<16x96xf32>
    %309 = vector.extract_strided_slice %308 {offsets = [0, 0], sizes = [16, 32], strides = [1, 1]} : vector<16x96xf32> to vector<16x32xf32>
    %310 = vector.extract_strided_slice %308 {offsets = [0, 32], sizes = [16, 32], strides = [1, 1]} : vector<16x96xf32> to vector<16x32xf32>
    %311 = vector.extract_strided_slice %308 {offsets = [0, 64], sizes = [16, 32], strides = [1, 1]} : vector<16x96xf32> to vector<16x32xf32>
    %312 = vector.extract_strided_slice %302 {offsets = [0, 96], sizes = [16, 32], strides = [1, 1]} : vector<16x128xf32> to vector<16x32xf32>
    %313 = math.tanh %312 : vector<16x32xf32>
    %c0_188 = arith.constant 0 : index
    %c0_189 = arith.constant 0 : index
    %314 = vector.load %arg12[%c0_188, %c0_189] : memref<16x32xf32, #tpu.memory_space<vmem>>, vector<16x32xf32>
    %315 = arith.mulf %310, %314 : vector<16x32xf32>
    %316 = arith.mulf %309, %313 : vector<16x32xf32>
    %317 = arith.addf %315, %316 : vector<16x32xf32>
    %318 = math.tanh %317 : vector<16x32xf32>
    %319 = arith.mulf %311, %318 : vector<16x32xf32>
    %320 = arith.mulf %294, %317 : vector<16x32xf32>
    %c0_190 = arith.constant 0 : index
    %c0_191 = arith.constant 0 : index
    %321 = vector.load %arg12[%c0_190, %c0_191] : memref<16x32xf32, #tpu.memory_space<vmem>>, vector<16x32xf32>
    %322 = arith.mulf %296, %321 : vector<16x32xf32>
    %323 = arith.addf %320, %322 : vector<16x32xf32>
    %c0_192 = arith.constant 0 : index
    %c0_193 = arith.constant 0 : index
    %324 = vector.load %arg12[%c0_192, %c0_193] : memref<16x32xf32, #tpu.memory_space<vmem>>, vector<16x32xf32>
    tpu.vector_store %arg12[%c0_192, %c0_193], %323 {strides = array<i32>} : memref<16x32xf32, #tpu.memory_space<vmem>>, vector<16x32xf32>,
    %325 = arith.mulf %294, %319 : vector<16x32xf32>
    %c0_194 = arith.constant 0 : index
    %c0_195 = arith.constant 0 : index
    %326 = vector.load %arg11[%c0_194, %c0_195] : memref<16x32xf32, #tpu.memory_space<vmem>>, vector<16x32xf32>
    %327 = arith.mulf %296, %326 : vector<16x32xf32>
    %328 = arith.addf %325, %327 : vector<16x32xf32>
    %c0_196 = arith.constant 0 : index
    %c0_197 = arith.constant 0 : index
    %329 = vector.load %arg11[%c0_196, %c0_197] : memref<16x32xf32, #tpu.memory_space<vmem>>, vector<16x32xf32>
    tpu.vector_store %arg11[%c0_196, %c0_197], %328 {strides = array<i32>} : memref<16x32xf32, #tpu.memory_space<vmem>>, vector<16x32xf32>,
    %c6_198 = arith.constant 6 : index
    %c0_199 = arith.constant 0 : index
    %c0_200 = arith.constant 0 : index
    %330 = vector.load %arg7[%c6_198, %c0_199, %c0_200] : memref<8x16x32xf32, #tpu.memory_space<vmem>>, vector<1x16x32xf32>
    %331 = vector.shape_cast %330 : vector<1x16x32xf32> to vector<16x32xf32>
    %332 = arith.mulf %294, %319 : vector<16x32xf32>
    %333 = arith.addf %332, %331 : vector<16x32xf32>
    %334 = vector.shape_cast %333 : vector<16x32xf32> to vector<1x16x32xf32>
    %c6_201 = arith.constant 6 : index
    %c0_202 = arith.constant 0 : index
    %c0_203 = arith.constant 0 : index
    %335 = vector.load %arg7[%c6_201, %c0_202, %c0_203] : memref<8x16x32xf32, #tpu.memory_space<vmem>>, vector<1x16x32xf32>
    tpu.vector_store %arg7[%c6_201, %c0_202, %c0_203], %334 {strides = array<i32>} : memref<8x16x32xf32, #tpu.memory_space<vmem>>, vector<1x16x32xf32>,
    %c7 = arith.constant 7 : index
    %c0_204 = arith.constant 0 : index
    %c0_205 = arith.constant 0 : index
    %336 = vector.load %arg3[%c7, %c0_204, %c0_205] : memref<8x16x1xf32, #tpu.memory_space<vmem>>, vector<1x16x1xf32>
    %337 = vector.shape_cast %336 : vector<1x16x1xf32> to vector<16x1xf32>
    %338 = vector.shape_cast %337 : vector<16x1xf32> to vector<16x1xf32>
    %339 = vector.broadcast %338 : vector<16x1xf32> to vector<16x32xf32>
    %cst_206 = arith.constant 1.000000e+00 : f32
    %340 = vector.broadcast %cst_206 : f32 to vector<16x32xf32>
    %341 = arith.subf %340, %339 : vector<16x32xf32>
    %c7_207 = arith.constant 7 : index
    %c0_208 = arith.constant 0 : index
    %c0_209 = arith.constant 0 : index
    %342 = vector.load %arg10[%c7_207, %c0_208, %c0_209] : memref<8x16x128xf32, #tpu.memory_space<vmem>>, vector<1x16x128xf32>
    %343 = vector.shape_cast %342 : vector<1x16x128xf32> to vector<16x128xf32>
    %c0_210 = arith.constant 0 : index
    %c0_211 = arith.constant 0 : index
    %344 = vector.load %arg11[%c0_210, %c0_211] : memref<16x32xf32, #tpu.memory_space<vmem>>, vector<16x32xf32>
    %345 = arith.truncf %344 : vector<16x32xf32> to vector<16x32xbf16>
    %cst_212 = arith.constant dense<0.000000e+00> : vector<16x128xf32>
    %346 = tpu.matmul %345, %6, %cst_212 {dimension_numbers = #tpu.dot_dimension_numbers<[1], [0], [0], [1], [0, 0, 1, 1], [], []>} : vector<16x32xbf16>, vector<32x128xbf16>, vector<16x128xf32> -> vector<16x128xf32>
    %347 = arith.addf %343, %346 : vector<16x128xf32>
    %348 = vector.extract_strided_slice %347 {offsets = [0, 0], sizes = [16, 96], strides = [1, 1]} : vector<16x128xf32> to vector<16x96xf32>
    %349 = arith.negf %348 : vector<16x96xf32>
    %350 = math.exp %349 : vector<16x96xf32>
    %cst_213 = arith.constant 1.000000e+00 : f32
    %351 = vector.broadcast %cst_213 : f32 to vector<16x96xf32>
    %352 = arith.addf %351, %350 : vector<16x96xf32>
    %353 = arith.divf %351, %352 : vector<16x96xf32>
    %354 = vector.extract_strided_slice %353 {offsets = [0, 0], sizes = [16, 32], strides = [1, 1]} : vector<16x96xf32> to vector<16x32xf32>
    %355 = vector.extract_strided_slice %353 {offsets = [0, 32], sizes = [16, 32], strides = [1, 1]} : vector<16x96xf32> to vector<16x32xf32>
    %356 = vector.extract_strided_slice %353 {offsets = [0, 64], sizes = [16, 32], strides = [1, 1]} : vector<16x96xf32> to vector<16x32xf32>
    %357 = vector.extract_strided_slice %347 {offsets = [0, 96], sizes = [16, 32], strides = [1, 1]} : vector<16x128xf32> to vector<16x32xf32>
    %358 = math.tanh %357 : vector<16x32xf32>
    %c0_214 = arith.constant 0 : index
    %c0_215 = arith.constant 0 : index
    %359 = vector.load %arg12[%c0_214, %c0_215] : memref<16x32xf32, #tpu.memory_space<vmem>>, vector<16x32xf32>
    %360 = arith.mulf %355, %359 : vector<16x32xf32>
    %361 = arith.mulf %354, %358 : vector<16x32xf32>
    %362 = arith.addf %360, %361 : vector<16x32xf32>
    %363 = math.tanh %362 : vector<16x32xf32>
    %364 = arith.mulf %356, %363 : vector<16x32xf32>
    %365 = arith.mulf %339, %362 : vector<16x32xf32>
    %c0_216 = arith.constant 0 : index
    %c0_217 = arith.constant 0 : index
    %366 = vector.load %arg12[%c0_216, %c0_217] : memref<16x32xf32, #tpu.memory_space<vmem>>, vector<16x32xf32>
    %367 = arith.mulf %341, %366 : vector<16x32xf32>
    %368 = arith.addf %365, %367 : vector<16x32xf32>
    %c0_218 = arith.constant 0 : index
    %c0_219 = arith.constant 0 : index
    %369 = vector.load %arg12[%c0_218, %c0_219] : memref<16x32xf32, #tpu.memory_space<vmem>>, vector<16x32xf32>
    tpu.vector_store %arg12[%c0_218, %c0_219], %368 {strides = array<i32>} : memref<16x32xf32, #tpu.memory_space<vmem>>, vector<16x32xf32>,
    %370 = arith.mulf %339, %364 : vector<16x32xf32>
    %c0_220 = arith.constant 0 : index
    %c0_221 = arith.constant 0 : index
    %371 = vector.load %arg11[%c0_220, %c0_221] : memref<16x32xf32, #tpu.memory_space<vmem>>, vector<16x32xf32>
    %372 = arith.mulf %341, %371 : vector<16x32xf32>
    %373 = arith.addf %370, %372 : vector<16x32xf32>
    %c0_222 = arith.constant 0 : index
    %c0_223 = arith.constant 0 : index
    %374 = vector.load %arg11[%c0_222, %c0_223] : memref<16x32xf32, #tpu.memory_space<vmem>>, vector<16x32xf32>
    tpu.vector_store %arg11[%c0_222, %c0_223], %373 {strides = array<i32>} : memref<16x32xf32, #tpu.memory_space<vmem>>, vector<16x32xf32>,
    %c7_224 = arith.constant 7 : index
    %c0_225 = arith.constant 0 : index
    %c0_226 = arith.constant 0 : index
    %375 = vector.load %arg7[%c7_224, %c0_225, %c0_226] : memref<8x16x32xf32, #tpu.memory_space<vmem>>, vector<1x16x32xf32>
    %376 = vector.shape_cast %375 : vector<1x16x32xf32> to vector<16x32xf32>
    %377 = arith.mulf %339, %364 : vector<16x32xf32>
    %378 = arith.addf %377, %376 : vector<16x32xf32>
    %379 = vector.shape_cast %378 : vector<16x32xf32> to vector<1x16x32xf32>
    %c7_227 = arith.constant 7 : index
    %c0_228 = arith.constant 0 : index
    %c0_229 = arith.constant 0 : index
    %380 = vector.load %arg7[%c7_227, %c0_228, %c0_229] : memref<8x16x32xf32, #tpu.memory_space<vmem>>, vector<1x16x32xf32>
    tpu.vector_store %arg7[%c7_227, %c0_228, %c0_229], %379 {strides = array<i32>} : memref<8x16x32xf32, #tpu.memory_space<vmem>>, vector<1x16x32xf32>,
    %c0_230 = arith.constant 0 : index
    %c0_231 = arith.constant 0 : index
    %381 = vector.load %arg11[%c0_230, %c0_231] : memref<16x32xf32, #tpu.memory_space<vmem>>, vector<16x32xf32>
    %c0_232 = arith.constant 0 : index
    %c0_233 = arith.constant 0 : index
    %382 = vector.load %arg8[%c0_232, %c0_233] : memref<16x32xf32, #tpu.memory_space<vmem>>, vector<16x32xf32>
    tpu.vector_store %arg8[%c0_232, %c0_233], %381 {strides = array<i32>} : memref<16x32xf32, #tpu.memory_space<vmem>>, vector<16x32xf32>,
    %c0_234 = arith.constant 0 : index
    %c0_235 = arith.constant 0 : index
    %383 = vector.load %arg12[%c0_234, %c0_235] : memref<16x32xf32, #tpu.memory_space<vmem>>, vector<16x32xf32>
    %c0_236 = arith.constant 0 : index
    %c0_237 = arith.constant 0 : index
    %384 = vector.load %arg9[%c0_236, %c0_237] : memref<16x32xf32, #tpu.memory_space<vmem>>, vector<16x32xf32>
    tpu.vector_store %arg9[%c0_236, %c0_237], %383 {strides = array<i32>} : memref<16x32xf32, #tpu.memory_space<vmem>>, vector<16x32xf32>,
    return
  }
  func.func @transform_0(%arg0: i32, %arg1: i32) -> (i32, i32, i32) {
    %c0_i32 = arith.constant 0 : i32
    %c0_i32_0 = arith.constant 0 : i32
    %c0_i32_1 = arith.constant 0 : i32
    return %c0_i32, %arg0, %c0_i32_0 : i32, i32, i32
  }
  func.func @transform_1(%arg0: i32, %arg1: i32) -> (i32, i32, i32) {
    %c0_i32 = arith.constant 0 : i32
    %c0_i32_0 = arith.constant 0 : i32
    %c0_i32_1 = arith.constant 0 : i32
    return %c0_i32, %arg0, %c0_i32_0 : i32, i32, i32
  }
  func.func @transform_2(%arg0: i32, %arg1: i32) -> (i32, i32, i32) {
    %c0_i32 = arith.constant 0 : i32
    %c0_i32_0 = arith.constant 0 : i32
    %c0_i32_1 = arith.constant 0 : i32
    return %arg1, %c0_i32, %c0_i32_0 : i32, i32, i32
  }
  func.func @transform_3(%arg0: i32, %arg1: i32) -> (i32, i32, i32) {
    %c0_i32 = arith.constant 0 : i32
    %c0_i32_0 = arith.constant 0 : i32
    %c0_i32_1 = arith.constant 0 : i32
    return %arg1, %c0_i32, %c0_i32_0 : i32, i32, i32
  }
  func.func @transform_4(%arg0: i32, %arg1: i32) -> (i32, i32, i32) {
    %c0_i32 = arith.constant 0 : i32
    %c0_i32_0 = arith.constant 0 : i32
    %c0_i32_1 = arith.constant 0 : i32
    return %arg1, %c0_i32, %c0_i32_0 : i32, i32, i32
  }
  func.func @transform_5(%arg0: i32, %arg1: i32) -> (i32, i32, i32) {
    %c0_i32 = arith.constant 0 : i32
    %c0_i32_0 = arith.constant 0 : i32
    %c0_i32_1 = arith.constant 0 : i32
    return %c0_i32, %arg0, %c0_i32_0 : i32, i32, i32
  }
  func.func @transform_6(%arg0: i32, %arg1: i32) -> (i32, i32) {
    %c0_i32 = arith.constant 0 : i32
    %c0_i32_0 = arith.constant 0 : i32
    return %arg0, %c0_i32 : i32, i32
  }
  func.func @transform_7(%arg0: i32, %arg1: i32) -> (i32, i32) {
    %c0_i32 = arith.constant 0 : i32
    %c0_i32_0 = arith.constant 0 : i32
    return %arg0, %c0_i32 : i32, i32
  }
}

</mosaic_0001>

<bundles_post_ra>
// kernel: tpu_custom_call.1
= control target key start
LH: loop header
LB: loop body
LE: loop exit
PB: predicated region body
PF: predicated region fallthrough
CT: control target
= control target key end

     0   :  { %s3930_s0 = inlined_call_operand.vmem [shape: f32[8,16,32], index: 0, kind: input, shape index: {}]   ;;  %s3931_s1 = inlined_call_operand.vmem [shape: f32[8,16,1], index: 1, kind: input, shape index: {}]   ;;  %s3932_s2 = inlined_call_operand.hbm [shape: bf16[2,32,128], index: 2, kind: input, shape index: {}]   ;;  %s3933_s3 = inlined_call_operand.hbm [shape: bf16[2,32,128], index: 3, kind: input, shape index: {}]   ;;  %s3934_s4 = inlined_call_operand.vmem [shape: f32[2,1,128], index: 4, kind: input, shape index: {}]   ;;  %s3935_s5 = inlined_call_operand.hbm [shape: f32[8,16,32], index: 5, kind: output, shape index: {0}]   ;;  %s3936_s6 = inlined_call_operand.hbm [shape: f32[16,32], index: 6, kind: output, shape index: {1}]   ;;  %s3937_s7 = inlined_call_operand.hbm [shape: f32[16,32], index: 7, kind: output, shape index: {2}]  }
   0x1   :  { %3940 = sst [smem:[#allocation19_spill]] %s3932_s2 }
   0x2   :  { %13 = vsyncpa [#allocation6], 0 }
   0x3   :  { %15 = vsyncpa [#allocation6 + $0x1], 0 }
   0x4   :  { %16 = vsyncpa [#allocation9], 0 }
   0x5   :  { %18 = vsyncpa [#allocation9 + $0x1], 0 }
   0x6   :  { %19 = vsyncpa [#allocation7], 0 }
   0x7   :  { %20 = vsyncpa [#allocation12], 0  ;;  %s3102_s24 = smov 0   ;;  %s3104_s25 = smov 0  }
   0x8   :  { %s3106_s26 = smov 0   ;;  %s3108_s27 = smov 0  }
   0x9   :  { %s3110_s28 = smov 0   ;;  %s3112_s29 = smov 0  }
   0xa LB: > { %s3938_s30 = sadd.s32 4294967295, %s3045_s29   ;;  %s35_s8 = sadd.s32 1, %s3041_s28  ;;  %s3045_s29 = sphi %s3112_s29, %s26_s29   ;;  %s3041_s28 = sphi %s3110_s28, %s3954_s28   ;;  %s3037_s27 = sphi %s3108_s27, %s3953_s27   ;;  %s3033_s26 = sphi %s3106_s26, %s3952_s26   ;;  %s3029_s25 = sphi %s3104_s25, %s3951_s25   ;;  %s3025_s24 = sphi %s3102_s24, %s3950_s24  }
   0xb   : > { %p36_p0 = scmp.ge.s32.totalorder %s35_s8, 2  ;;  %s97_s9 = sadd.s32 1, %s3033_s26 }
   0xc   : > { %p104_p1 = scmp.ne.s32.totalorder %s3033_s26, %s3029_s25  ;;  %p105_p2 = scmp.eq.s32.totalorder %s3045_s29, 0 }
   0xd   : > { %s3956_s8 = smov (%p36_p0, %s35_s8), 0  ;;  %p110_p4 = scmp.ne.s32.totalorder %s3029_s25, %s3025_s24 }
   0xe   : > { %3941 = sst [smem:[#allocation18_spill]] %s3956_s8  ;;  %p3138_p3 = por %p105_p2, %p104_p1 }
   0xf   : > { %s94_s11 = ssub.s32 %s3041_s28, %s3956_s8  ;;  %p111_p5 = scmp.eq.s32.totalorder %s3938_s30, 0 }
  0x10   : > { %p95_p6 = scmp.eq.s32.totalorder %s94_s11, 0  ;;  %p2650_p8 = scmp.lt.s32.totalorder %s3045_s29, 2 }
  0x11   : > { %p3147_p7 = por %p111_p5, %p110_p4  ;;  %s3156_s14 = sand.u32 1, %s3033_s26  }
  0x12   : > { %s3153_s13 = scalar_select %p95_p6, %s3033_s26, %s97_s9  }
  0x13   : > { %s2507_s15 = sshll.u32 %s3041_s28, 8  ;;  %s2438_s16 = sshll.u32 %s3156_s14, 4 }
  0x14   : > { %s3944_s2 = sld [smem:[#allocation19_spill]]  ;;  %s286_s20 = scalar_lea.vmem [#allocation5], %s2438_s16 }
  0x15   : > { %s293_s21 = sshll.u32 %s286_s20, 4  ;;  %p3167_p9 = pnand %p2650_p8, %p3138_p3  ;;  %s294_s21 = int_to_ptr.vmem [resolvable:$true] %s293_s21 }
  0x16   : > { %s283_s23 = scalar_lea.sflag [#allocation6], %s3156_s14  ;;  %s2868_s24 = scalar_lea.vmem %s294_s21, 256 }
  0x17   : > { %p2857_p10 = pneg %p3167_p9  ;;  %p2869_p11 = scmp.ne.s32.totalorder %s294_s21, %s2868_s24 }
  0x18   : > { %s3047_s9 = smov [#allocation5]  }
  0x19   : > { %p2871_p12 = pnand %p2869_p11, %p2857_p10  ;;  %s2873_s11 = sshll.u32 %s3047_s9, 4  ;;  %s2874_s11 = int_to_ptr.vmem [resolvable:$false] %s2873_s11 }
  0x1a   : > { %s292_s19 = scalar_lea.hbm %s3944_s2, %s2507_s15  ;;  %s2875_s10 = scalar_lea.vmem %s2874_s11, 512 }
  0x1b   : > { %p2872_p13 = pneg %p2871_p12  ;;  %p2876_p0 = scmp.lt.s32.totalorder %s294_s21, %s2874_s11 }
  0x1c   : > { %p2877_p1 = scmp.lt.s32.totalorder %s2875_s10, %s2868_s24 }
  0x1e   : > { %p2878_p2 = por %p2877_p1, %p2876_p0 }
  0x20   : > { %p2879_p3 = pnand %p2878_p2, %p2872_p13 }
  0x22   : > { %2882 = shalt.err (!%p2879_p3)
}
  0x23   : > { %s3048_s17 = smov 64   ;;  %s3049_s18 = smov 4  }
  0x24   : > { %2646 = dma.hbm_to_vmem [thread:$0]  (!%p3167_p9), %s292_s19, 256, %s294_s21, %s283_s23, %s3048_s17, %s3048_s17, %s3049_s18  }
  0x25   : > { %p2444_p4 = scmp.ge.s32.totalorder %s3045_s29, 1  ;;  %p328_p5 = scmp.lt.s32.totalorder %s3045_s29, 3 }
  0x26   : > { %s313_s11 = scalar_lea.hbm %s3933_s3, %s2507_s15  ;;  %s307_s10 = scalar_lea.vmem [#allocation8], %s2438_s16 }
  0x27   : > { %p3181_p6 = pnand %p2444_p4, %p328_p5  ;;  %s314_s30 = sshll.u32 %s307_s10, 4  ;;  %s315_s30 = int_to_ptr.vmem [resolvable:$true] %s314_s30 }
  0x28   : > { %s304_s2 = scalar_lea.sflag [#allocation9], %s3156_s14  ;;  %s2896_s8 = scalar_lea.vmem %s315_s30, 256 }
  0x29   : > { %p2897_p8 = scmp.ne.s32.totalorder %s315_s30, %s2896_s8  ;;  %s3050_s19 = smov [#allocation8]  }
  0x2a   : > { %s2901_s21 = sshll.u32 %s3050_s19, 4  ;;  %s2902_s21 = int_to_ptr.vmem [resolvable:$false] %s2901_s21 }
  0x2b   : > { %p2899_p11 = pnand %p2897_p8, %p2857_p10  ;;  %s2903_s23 = scalar_lea.vmem %s2902_s21, 512 }
  0x2c   : > { %p2904_p13 = scmp.lt.s32.totalorder %s315_s30, %s2902_s21  ;;  %p2905_p0 = scmp.lt.s32.totalorder %s2903_s23, %s2896_s8 }
  0x2d   : > { %p2900_p12 = pneg %p2899_p11 }
  0x2e   : > { %p2906_p1 = por %p2905_p0, %p2904_p13 }
  0x30   : > { %p2907_p2 = pnand %p2906_p1, %p2900_p12 }
  0x32   : > { %2910 = shalt.err (!%p2907_p2)
}
  0x33   : > { %2649 = dma.hbm_to_vmem [thread:$0]  (!%p3167_p9), %s313_s11, 256, %s315_s30, %s304_s2, %s3048_s17, %s3048_s17, %s3049_s18  }
  0x34   : > { %332 = sbr.rel (%p3181_p6) target bundleno = 5804 (0x16ac), region = 40  ;;  %s334_s14 = sand.u32 (!%p3181_p6), 1, %s3029_s25  }
  0x35   : > { %s2445_s15 = sshll.u32 (!%p3181_p6), %s334_s14, 4  ;;  %s335_s16 = scalar_lea.sflag (!%p3181_p6), [#allocation6], %s334_s14 }
  0x36   : > { %s3199_s24 = scalar_lea.vmem (!%p3181_p6), [#allocation5], %s2445_s15 }
  0x39   : > { %3008 = dma.done.wait (%p3147_p7), %s335_s16, 256  }
  0x3a   : > { %3010 = vsyncadd (%p3147_p7), %s335_s16, 4294967040  ;;  %s344_s8 = scalar_lea.sflag [#allocation9], %s334_s14  ;;  %s3205_s9 = scalar_lea.vmem [#allocation8], %s2445_s15 }
  0x3b   : > { %3012 = dma.done.wait (%p3147_p7), %s344_s8, 256  }
  0x3c   : > { %3014 = vsyncadd (%p3147_p7), %s344_s8, 4294967040  ;;  %p403_p9 = scmp.lt.s32.totalorder %s3037_s27, 1  ;;  %p2447_p10 = scmp.ne.s32.totalorder %s3037_s27, 0 }
  0x3e   : > { %s404_s2 = scalar_select %p403_p9, %s3037_s27, 1 }
  0x3f   : > { %413 = sbr.rel (%p2447_p10) target bundleno = 77 (0x4d), region = 52 }
  0x40   : > { %s3216_s17 = scalar_lea.vmem %s3934_s4, %s404_s2 }
  0x44   : > { %v414_v0 = vld [vmem:[%s3930_s0] sm:$0xff]  ;;  %vm430_vm0 = vcmask 261120   ;;  %v415_v1 = vld [vmem:[%s3930_s0 + $0x8] sm:$0xff]  ;;  %v416_v2 = vld [vmem:[%s3930_s0 + $0x10] sm:$0xff] }
  0x45   : > { %431 = vst.msk [vmem:[#allocation10] sm:$0xff] %vm430_vm0, %v414_v0  ;;  %432 = vst.msk [vmem:[#allocation10 + $0x8] sm:$0xff] %vm430_vm0, %v415_v1  ;;  %v417_v3 = vld [vmem:[%s3930_s0 + $0x18] sm:$0xff]  ;;  %v418_v4 = vld [vmem:[%s3930_s0 + $0x20] sm:$0xff] }
  0x46   : > { %433 = vst.msk [vmem:[#allocation10 + $0x10] sm:$0xff] %vm430_vm0, %v416_v2  ;;  %v419_v5 = vld [vmem:[%s3930_s0 + $0x28] sm:$0xff]  ;;  %434 = vst.msk [vmem:[#allocation10 + $0x18] sm:$0xff] %vm430_vm0, %v417_v3  ;;  %v420_v6 = vld [vmem:[%s3930_s0 + $0x30] sm:$0xff] }
  0x47   : > { %435 = vst.msk [vmem:[#allocation10 + $0x20] sm:$0xff] %vm430_vm0, %v418_v4  ;;  %436 = vst.msk [vmem:[#allocation10 + $0x28] sm:$0xff] %vm430_vm0, %v419_v5  ;;  %v421_v7 = vld [vmem:[%s3930_s0 + $0x38] sm:$0xff]  ;;  %v422_v8 = vld [vmem:[%s3930_s0 + $0x40] sm:$0xff] }
  0x48   : > { %437 = vst.msk [vmem:[#allocation10 + $0x30] sm:$0xff] %vm430_vm0, %v420_v6  ;;  %438 = vst.msk [vmem:[#allocation10 + $0x38] sm:$0xff] %vm430_vm0, %v421_v7  ;;  %v423_v9 = vld [vmem:[%s3930_s0 + $0x48] sm:$0xff]  ;;  %v424_v10 = vld [vmem:[%s3930_s0 + $0x50] sm:$0xff] }
  0x49   : > { %439 = vst.msk [vmem:[#allocation10 + $0x40] sm:$0xff] %vm430_vm0, %v422_v8  ;;  %v425_v11 = vld [vmem:[%s3930_s0 + $0x58] sm:$0xff]  ;;  %440 = vst.msk [vmem:[#allocation10 + $0x48] sm:$0xff] %vm430_vm0, %v423_v9  ;;  %v426_v12 = vld [vmem:[%s3930_s0 + $0x60] sm:$0xff] }
  0x4a   : > { %441 = vst.msk [vmem:[#allocation10 + $0x50] sm:$0xff] %vm430_vm0, %v424_v10  ;;  %442 = vst.msk [vmem:[#allocation10 + $0x58] sm:$0xff] %vm430_vm0, %v425_v11  ;;  %v427_v13 = vld [vmem:[%s3930_s0 + $0x68] sm:$0xff]  ;;  %v428_v14 = vld [vmem:[%s3930_s0 + $0x70] sm:$0xff] }
  0x4b   : > { %443 = vst.msk [vmem:[#allocation10 + $0x60] sm:$0xff] %vm430_vm0, %v426_v12  ;;  %444 = vst.msk [vmem:[#allocation10 + $0x68] sm:$0xff] %vm430_vm0, %v427_v13  ;;  %v429_v15 = vld [vmem:[%s3930_s0 + $0x78] sm:$0xff] }
  0x4c   : > { %445 = vst.msk [vmem:[#allocation10 + $0x70] sm:$0xff] %vm430_vm0, %v428_v14  ;;  %446 = vst.msk [vmem:[#allocation10 + $0x78] sm:$0xff] %vm430_vm0, %v429_v15 }
  0x4d PF: > { %v2720_v16 = vld [vmem:[%s3199_s24 + $0x8] sm:$0xff]   ;;  %v3051_v17 = vmov 0.0   ;;  %vm456_vm1 = vcmask 261120   ;;  %v2722_v19 = vld [vmem:[%s3199_s24] sm:$0xff]   ;;  %vm3052_vm2 = vmmov 0   ;;  %s3053_s24 = smov 32  }
  0x4e   : > { %2563 = vmatprep.subr.bf16.mxu1 %v3051_v17  ;;  %v3286_v18 = vld [vmem:[%s3205_s9 + $0x8] sm:$0xff]   ;;  %2543 = vmatprep.subr.bf16.mxu0 %v2720_v16  ;;  %457 = vst.msk [vmem:[#allocation3] sm:$0xff] %vm456_vm1, %v3051_v17  ;;  %458 = vst.msk [vmem:[#allocation3 + $0x8] sm:$0xff] %vm456_vm1, %v3051_v17  ;;  %v3299_v20 = vld [vmem:[%s3205_s9] sm:$0xff]   ;;  %v3054_v45 = vmov 0   ;;  %s3055_s10 = smov 64  }
  0x4f   : > { %459 = vst.msk [vmem:[#allocation4] sm:$0xff] %vm456_vm1, %v3051_v17  ;;  %460 = vst.msk [vmem:[#allocation4 + $0x8] sm:$0xff] %vm456_vm1, %v3051_v17  ;;  %2544 = vmatpush3.bf16.msra.mxu0 %v2720_v16  ;;  %2564 = vmatpush3.bf16.msra.mxu1 %v3286_v18  ;;  %v461_v21 = vld [vmem:[#allocation10] sm:$0xff]  ;;  %v462_v22 = vld [vmem:[#allocation10 + $0x8] sm:$0xff]  ;;  %s3056_s19 = smov 96   ;;  %s3058_s12 = smov [#allocation13]  }
  0x50   : > { %2545 = vmatprep.subr.bf16.mxu0 %v2722_v19  ;;  %2565 = vmatprep.subr.bf16.mxu1 %v3051_v17  ;;  %v463_v23 = vld [vmem:[#allocation10 + $0x10] sm:$0xff]  ;;  %v477_v24 = vpack.c.bf16 %v462_v22, %v461_v21  ;;  %v464_v25 = vld [vmem:[#allocation10 + $0x18] sm:$0xff]  ;;  %v3337_v33 = vld [vmem:[%s3216_s17] ss:$0 sm:$0xff]  ;;  %s2282_s27 = sshll.u32 %s3058_s12, 4  ;;  %s3059_s21 = smov [#allocation10]   ;;  %s3865_s27 = int_to_ptr.vmem [resolvable:$true] %s2282_s27 }
  0x51   : > { %2567 = vmatprep.mubr.msk.bf16.mxu1 %vm3052_vm2, %v3051_v17  ;;  %v478_v26 = vpack.c.bf16 %v464_v25, %v463_v23  ;;  %2718 = vset.pattern.permute.xlu0 %v3054_v45  ;;  %v640_v59 = vld [vmem:[%s3931_s1] sm:$0xff]  ;;  %v641_v61 = vld [vmem:[%s3931_s1 + $0x8] sm:$0xff] }
  0x52   : > { %2547 = vmatprep.mubr.msk.bf16.mxu0 %vm456_vm1, %v477_v24  ;;  %2719 = vset.pattern.permute.xlu1 %v3054_v45 }
  0x53   : > { %2546 = vmatpush3.bf16.msra.mxu0 %v2722_v19  ;;  %2566 = vmatpush3.bf16.msra.mxu1 %v3299_v20 }
  0x54   : > { %2571 = vmatprep.subr.bf16.mxu1 %v3051_v17  ;;  %2595 = vmatprep.subr.bf16.mxu0 %v3051_v17 }
  0x55   : > { %v3307_v27 = vld [vmem:[#allocation3] sm:$0xff]  ;;  %v3309_v28 = vld [vmem:[#allocation3 + $0x8] sm:$0xff] }
  0x56   : > { %v3311_v29 = vld [vmem:[#allocation4] sm:$0xff]  ;;  %2548 = vmatmul.mubr.msk.bf16.vlgmr.msra.gmra.mxu0 %vm456_vm1, %v478_v26  ;;  %v658_v30 = vpack.c.bf16 %v3309_v28, %v3307_v27  ;;  %v3319_v31 = vld [vmem:[#allocation4 + $0x8] sm:$0xff] }
  0x57   : > { %735 = vrot.lane.b32.xlu1 %v3311_v29, %s3053_s24  ;;  %2596 = vmatpush3.bf16.msra.mxu0 %v3286_v18 }
  0x58   : > { %2568 = vmatmul.mubr.msk.bf16.vlgmr.msra.gmra.mxu1 %vm456_vm1, %v658_v30  ;;  %2597 = vmatprep.subr.bf16.mxu0 %v3051_v17 }
  0x59   : > { %2572 = vmatpush3.bf16.msra.mxu1 %v3286_v18  ;;  %2575 = vmatprep.mubr.msk.bf16.mxu1 %vm3052_vm2, %v3051_v17 }
  0x5a   : > { %2573 = vmatprep.subr.bf16.mxu1 %v3051_v17 }
  0x5b   : > { %737 = vrot.lane.b32.xlu1 %v3319_v31, %s3053_s24  ;;  %2598 = vmatpush3.bf16.msra.mxu0 %v3299_v20 }
  0x5c   : > { %2611 = vmatprep.subr.bf16.mxu0 %v3051_v17 }
  0x5d   : > { %2574 = vmatpush3.bf16.msra.mxu1 %v3299_v20 }
  0x5e   : > { %2579 = vmatprep.subr.bf16.mxu1 %v3051_v17 }
  0xc9   : > { %v736_v62 = vpop.permute.xlu1 %735 }
  0xcd   : > { %v738_v0 = vpop.permute.xlu1 %737 }
 0x116   : > { %v3334_v32 = vpop.f32.mrf.mxu0 }
 0x117   : > { %v570_v45 = vadd.f32 %v3334_v32, %v3337_v33 }
 0x118   : > { %v708_v34 = vpop.f32.mrf.mxu1  ;;  %v561_v35 = vpop.f32.mrf.mxu0 }
 0x119   : > { %v562_v36 = vadd.f32 %v3337_v33, %v561_v35 }
 0x11a   : > { %v2569_v37 = vpop.f32.mrf.mxu1  ;;  %v3340_v38 = vpop.f32.mrf.mxu0 }
 0x11b   : > { %v715_v39 = vadd.f32 %v708_v34, %v562_v36 }
 0x11c   : > { %v711_v40 = vpop.f32.mrf.mxu1  ;;  %v564_v41 = vpop.f32.mrf.mxu0 }
 0x11d   : > { %2724 = vtanh.f32 %v715_v39  ;;  %v565_v42 = vadd.f32 %v3337_v33, %v564_v41  ;;  %v2462_v48 = vmul.f32 -1.442695, %v715_v39 }
 0x11e   : > { %v2570_v43 = vpop.f32.mrf.mxu1 }
 0x11f   : > { %v716_v44 = vadd.f32 %v711_v40, %v565_v42 }
 0x121   : > { %2726 = vtanh.f32 %v716_v44  ;;  %v2463_v49 = vmul.f32 -1.442695, %v716_v44 }
 0x122   : > { %2728 = vpow2.f32 %v2462_v48 }
 0x123   : > { %2730 = vpow2.f32 %v2463_v49  ;;  %v573_v49 = vadd.f32 %v3340_v38, %v3337_v33 }
 0x12a   : > { %v2725_v46 = vpop.eup %2724 }
 0x12b   : > { %745 = vrot.lane.b32.xlu0 %v2725_v46, %s3053_s24 }
 0x12e   : > { %v2727_v47 = vpop.eup %2726 }
 0x12f   : > { %747 = vrot.lane.b32.xlu0 %v2727_v47, %s3053_s24  ;;  %v2729_v50 = vpop.eup %2728 }
 0x130   : > { %v723_v51 = vadd.f32 1.0, %v2729_v50  ;;  %v2731_v52 = vpop.eup %2730 }
 0x131   : > { %v724_v53 = vadd.f32 1.0, %v2731_v52 }
 0x132   : > { %2732 = vrcp.f32 %v723_v51 }
 0x133   : > { %2734 = vrcp.f32 %v724_v53 }
 0x13f   : > { %v2733_v54 = vpop.eup %2732 }
 0x140   : > { %v2735_v57 = vpop.eup %2734  ;;  %v741_v63 = vmul.f32 %v2733_v54, %v736_v62 }
 0x141   : > { %v742_v3 = vmul.f32 %v2735_v57, %v738_v0 }
 0x19d   : > { %v746_v55 = vpop.permute.xlu0 %745 }
 0x19e   : > { %v751_v56 = vmul.f32 %v2733_v54, %v746_v55 }
 0x1a0   : > { %755 = vrot.lane.b32.xlu0 %v751_v56, %s3053_s24 }
 0x1a1   : > { %v748_v58 = vpop.permute.xlu0 %747 }
 0x1a2   : > { %v752_v60 = vmul.f32 %v2735_v57, %v748_v58 }
 0x1a4   : > { %757 = vrot.lane.b32.xlu1 %v752_v60, %s3053_s24  ;;  %644 = vperm.xlu0 %2718, %v640_v59  }
 0x1a8   : > { %649 = vperm.xlu1 %2719, %v641_v61  }
 0x212   : > { %v756_v1 = vpop.permute.xlu0 %755 }
 0x213   : > { %v761_v2 = vadd.f32 %v756_v1, %v741_v63 }
 0x215   : > { %2736 = vtanh.f32 %v761_v2 }
 0x216   : > { %v758_v4 = vpop.permute.xlu1 %757 }
 0x217   : > { %v762_v5 = vadd.f32 %v758_v4, %v742_v3  ;;  %v2465_v4 = vld [vmem:[%s3931_s1 + $0x18] sm:$0xff] }
 0x219   : > { %2738 = vtanh.f32 %v762_v5 }
 0x21f   : > { %v645_v6 = vpop.permute.xlu0 %644 }
 0x220   : > { %v652_v7 = vsub.f32 1.0, %v645_v6  ;;  %v775_v34 = vmul.f32 %v761_v2, %v645_v6  ;;  %v2464_v2 = vld [vmem:[%s3931_s1 + $0x10] sm:$0xff] }
 0x222   : > { %v2737_v8 = vpop.eup %2736  ;;  %v803_v10 = vmul.f32 %v3307_v27, %v652_v7  ;;  %v777_v27 = vmul.f32 %v3311_v29, %v652_v7 }
 0x223   : > { %v650_v9 = vpop.permute.xlu1 %649  ;;  %767 = vrot.lane.b32.xlu1 %v2737_v8, %s3053_s24 }
 0x224   : > { %v653_v11 = vsub.f32 1.0, %v650_v9  ;;  %v776_v29 = vmul.f32 %v762_v5, %v650_v9 }
 0x226   : > { %v2739_v12 = vpop.eup %2738  ;;  %v804_v13 = vmul.f32 %v3309_v28, %v653_v11  ;;  %v778_v28 = vmul.f32 %v3319_v31, %v653_v11 }
 0x227   : > { %769 = vrot.lane.b32.xlu0 %v2739_v12, %s3053_s24  ;;  %807 = vrot.lane.b32.xlu1 %v803_v10, %s3055_s10 }
 0x22b   : > { %809 = vrot.lane.b32.xlu0 %v804_v13, %s3055_s10 }
 0x295   : > { %v768_v14 = vpop.permute.xlu1 %767 }
 0x296   : > { %v773_v15 = vmul.f32 %v2733_v54, %v768_v14 }
 0x298   : > { %v3359_v16 = vmul.f32 %v773_v15, %v645_v6 }
 0x299   : > { %v770_v19 = vpop.permute.xlu0 %769  ;;  %v808_v21 = vpop.permute.xlu1 %807 }
 0x29a   : > { %v774_v22 = vmul.f32 %v2735_v57, %v770_v19  ;;  %v813_v23 = vadd.f32 %v808_v21, %v3359_v16 }
 0x29c   : > { %817 = vrot.lane.b32.xlu1 %v813_v23, %s3055_s10  ;;  %v3363_v24 = vmul.f32 %v774_v22, %v650_v9 }
 0x29d   : > { %v810_v25 = vpop.permute.xlu0 %809 }
 0x29e   : > { %v814_v26 = vadd.f32 %v810_v25, %v3363_v24 }
 0x2a0   : > { %819 = vrot.lane.b32.xlu0 %v814_v26, %s3055_s10  ;;  %781 = vrot.lane.b32.xlu1 %v777_v27, %s3053_s24  ;;  %v465_v26 = vld [vmem:[#allocation10 + $0x20] sm:$0xff]  ;;  %v466_v27 = vld [vmem:[#allocation10 + $0x28] sm:$0xff] }
 0x2a4   : > { %783 = vrot.lane.b32.xlu0 %v778_v28, %s3053_s24  ;;  %v479_v28 = vpack.c.bf16 %v466_v27, %v465_v26  ;;  %v2469_v26 = vld [vmem:[%s3931_s1 + $0x20] sm:$0xff] }
 0x2a6   : > { %2551 = vmatprep.mubr.msk.bf16.mxu0 %vm456_vm1, %v479_v28  ;;  %v2470_v28 = vld [vmem:[%s3931_s1 + $0x28] sm:$0xff] }
 0x30e   : > { %v818_v30 = vpop.permute.xlu1 %817 }
 0x30f   : > { %823 = vst.msk [vmem:[#allocation3] sm:$0xff] %vm456_vm1, %v818_v30  ;;  %v467_v30 = vld [vmem:[#allocation10 + $0x30] sm:$0xff] }
 0x312   : > { %v820_v35 = vpop.permute.xlu0 %819  ;;  %v782_v36 = vpop.permute.xlu1 %781 }
 0x313   : > { %824 = vst.msk [vmem:[#allocation3 + $0x8] sm:$0xff] %vm456_vm1, %v820_v35  ;;  %v787_v37 = vadd.f32 %v782_v36, %v775_v34  ;;  %v468_v34 = vld [vmem:[#allocation10 + $0x38] sm:$0xff] }
 0x314   : > { %v480_v35 = vpack.c.bf16 %v468_v34, %v467_v30 }
 0x315   : > { %791 = vrot.lane.b32.xlu1 %v787_v37, %s3056_s19 }
 0x316   : > { %v784_v39 = vpop.permute.xlu0 %783  ;;  %v3375_v31 = vld [vmem:[#allocation3] sm:$0xff]  ;;  %2552 = vmatmul.mubr.msk.bf16.gmra.mxu0 %vm456_vm1, %v480_v35 }
 0x317   : > { %v788_v40 = vadd.f32 %v784_v39, %v776_v29 }
 0x319   : > { %793 = vrot.lane.b32.xlu0 %v788_v40, %s3056_s19 }
 0x31a   : > { %v3377_v41 = vld [vmem:[#allocation3 + $0x8] sm:$0xff] }
 0x31b   : > { %v867_v42 = vpack.c.bf16 %v3377_v41, %v3375_v31 }
 0x31d   : > { %2576 = vmatmul.mubr.msk.bf16.vlgmr.msra.gmra.mxu1 %vm456_vm1, %v867_v42 }
 0x31e   : > { %2580 = vmatpush3.bf16.msra.mxu1 %v3286_v18  ;;  %2583 = vmatprep.mubr.msk.bf16.mxu1 %vm3052_vm2, %v3051_v17 }
 0x31f   : > { %2581 = vmatprep.subr.bf16.mxu1 %v3051_v17 }
 0x322   : > { %2582 = vmatpush3.bf16.msra.mxu1 %v3299_v20 }
 0x323   : > { %2587 = vmatprep.subr.bf16.mxu1 %v3051_v17 }
 0x387   : > { %v792_v43 = vpop.permute.xlu1 %791 }
 0x388   : > { %797 = vst.msk [vmem:[#allocation4] sm:$0xff] %vm456_vm1, %v792_v43 }
 0x38b   : > { %v794_v44 = vpop.permute.xlu0 %793 }
 0x38c   : > { %798 = vst.msk [vmem:[#allocation4 + $0x8] sm:$0xff] %vm456_vm1, %v794_v44 }
 0x38f   : > { %v3395_v55 = vld [vmem:[#allocation4] sm:$0xff] }
 0x393   : > { %v3400_v32 = vld [vmem:[#allocation4 + $0x8] sm:$0xff] }
 0x3dd   : > { %v905_v46 = vpop.f32.mrf.mxu1 }
 0x3de   : > { %v912_v47 = vadd.f32 %v905_v46, %v570_v45 }
 0x3df   : > { %v2577_v48 = vpop.f32.mrf.mxu1 }
 0x3e0   : > { %2740 = vtanh.f32 %v912_v47  ;;  %v2467_v38 = vmul.f32 -1.442695, %v912_v47 }
 0x3e1   : > { %v908_v50 = vpop.f32.mrf.mxu1 }
 0x3e2   : > { %v913_v51 = vadd.f32 %v908_v50, %v573_v49 }
 0x3e3   : > { %v2578_v52 = vpop.f32.mrf.mxu1 }
 0x3e4   : > { %2742 = vtanh.f32 %v913_v51  ;;  %v2468_v56 = vmul.f32 -1.442695, %v913_v51 }
 0x3e5   : > { %2744 = vpow2.f32 %v2467_v38 }
 0x3e6   : > { %2746 = vpow2.f32 %v2468_v56 }
 0x3ed   : > { %v2741_v53 = vpop.eup %2740 }
 0x3ee   : > { %942 = vrot.lane.b32.xlu1 %v2741_v53, %s3053_s24 }
 0x3f1   : > { %v2743_v54 = vpop.eup %2742 }
 0x3f2   : > { %944 = vrot.lane.b32.xlu0 %v2743_v54, %s3053_s24  ;;  %932 = vrot.lane.b32.xlu1 %v3395_v55, %s3053_s24  ;;  %v2745_v57 = vpop.eup %2744 }
 0x3f3   : > { %v920_v58 = vadd.f32 1.0, %v2745_v57  ;;  %v2747_v59 = vpop.eup %2746 }
 0x3f4   : > { %v921_v60 = vadd.f32 1.0, %v2747_v59 }
 0x3f5   : > { %2748 = vrcp.f32 %v920_v58  ;;  %v3451_v58 = vpop.f32.mrf.mxu0 }
 0x3f6   : > { %934 = vrot.lane.b32.xlu0 %v3400_v32, %s3053_s24  ;;  %2750 = vrcp.f32 %v921_v60 }
 0x3f7   : > { %v577_v59 = vpop.f32.mrf.mxu0 }
 0x3f9   : > { %v3453_v60 = vpop.f32.mrf.mxu0 }
 0x402   : > { %v2749_v61 = vpop.eup %2748 }
 0x403   : > { %v2751_v0 = vpop.eup %2750 }
 0x460   : > { %v943_v62 = vpop.permute.xlu1 %942 }
 0x461   : > { %v948_v63 = vmul.f32 %v2749_v61, %v943_v62  ;;  %v580_v62 = vpop.f32.mrf.mxu0 }
 0x463   : > { %952 = vrot.lane.b32.xlu1 %v948_v63, %s3053_s24 }
 0x464   : > { %v945_v1 = vpop.permute.xlu0 %944  ;;  %v933_v5 = vpop.permute.xlu1 %932 }
 0x465   : > { %v949_v3 = vmul.f32 %v2751_v0, %v945_v1  ;;  %v938_v6 = vmul.f32 %v2749_v61, %v933_v5 }
 0x467   : > { %954 = vrot.lane.b32.xlu0 %v949_v3, %s3053_s24  ;;  %852 = vperm.xlu1 %2719, %v2464_v2   ;;  %v581_v2 = vadd.f32 %v3337_v33, %v580_v62 }
 0x468   : > { %v935_v7 = vpop.permute.xlu0 %934 }
 0x469   : > { %v939_v10 = vmul.f32 %v2751_v0, %v935_v7 }
 0x46b   : > { %857 = vperm.xlu0 %2718, %v2465_v4  }
 0x4d5   : > { %v953_v8 = vpop.permute.xlu1 %952 }
 0x4d6   : > { %v958_v9 = vadd.f32 %v953_v8, %v938_v6 }
 0x4d8   : > { %2752 = vtanh.f32 %v958_v9 }
 0x4d9   : > { %v955_v11 = vpop.permute.xlu0 %954 }
 0x4da   : > { %v959_v12 = vadd.f32 %v955_v11, %v939_v10 }
 0x4dc   : > { %2754 = vtanh.f32 %v959_v12 }
 0x4e2   : > { %v853_v13 = vpop.permute.xlu1 %852 }
 0x4e3   : > { %v860_v14 = vsub.f32 1.0, %v853_v13  ;;  %v972_v48 = vmul.f32 %v958_v9, %v853_v13 }
 0x4e5   : > { %v2753_v15 = vpop.eup %2752  ;;  %v1000_v22 = vmul.f32 %v3375_v31, %v860_v14  ;;  %v974_v45 = vmul.f32 %v3395_v55, %v860_v14 }
 0x4e6   : > { %v858_v19 = vpop.permute.xlu0 %857  ;;  %964 = vrot.lane.b32.xlu1 %v2753_v15, %s3053_s24 }
 0x4e7   : > { %v861_v21 = vsub.f32 1.0, %v858_v19  ;;  %v973_v52 = vmul.f32 %v959_v12, %v858_v19 }
 0x4e9   : > { %v2755_v23 = vpop.eup %2754  ;;  %v1001_v25 = vmul.f32 %v3377_v41, %v861_v21  ;;  %v975_v46 = vmul.f32 %v3400_v32, %v861_v21 }
 0x4ea   : > { %966 = vrot.lane.b32.xlu0 %v2755_v23, %s3053_s24  ;;  %1004 = vrot.lane.b32.xlu1 %v1000_v22, %s3055_s10 }
 0x4ee   : > { %1006 = vrot.lane.b32.xlu0 %v1001_v25, %s3055_s10 }
 0x558   : > { %v965_v36 = vpop.permute.xlu1 %964 }
 0x559   : > { %v970_v37 = vmul.f32 %v2749_v61, %v965_v36  ;;  %v578_v61 = vadd.f32 %v3337_v33, %v577_v59 }
 0x55b   : > { %v3420_v29 = vmul.f32 %v970_v37, %v853_v13 }
 0x55c   : > { %v967_v39 = vpop.permute.xlu0 %966  ;;  %v1005_v40 = vpop.permute.xlu1 %1004 }
 0x55d   : > { %v971_v31 = vmul.f32 %v2751_v0, %v967_v39  ;;  %v1010_v41 = vadd.f32 %v1005_v40, %v3420_v29 }
 0x55f   : > { %1014 = vrot.lane.b32.xlu1 %v1010_v41, %s3055_s10  ;;  %v3424_v42 = vmul.f32 %v971_v31, %v858_v19 }
 0x560   : > { %v1007_v43 = vpop.permute.xlu0 %1006 }
 0x561   : > { %v1011_v44 = vadd.f32 %v1007_v43, %v3424_v42 }
 0x563   : > { %1016 = vrot.lane.b32.xlu0 %v1011_v44, %s3055_s10  ;;  %978 = vrot.lane.b32.xlu1 %v974_v45, %s3053_s24 }
 0x567   : > { %980 = vrot.lane.b32.xlu0 %v975_v46, %s3053_s24 }
 0x5d1   : > { %v1015_v47 = vpop.permute.xlu1 %1014 }
 0x5d2   : > { %1020 = vst.msk [vmem:[#allocation3] sm:$0xff] %vm456_vm1, %v1015_v47 }
 0x5d5   : > { %v1017_v49 = vpop.permute.xlu0 %1016  ;;  %v979_v50 = vpop.permute.xlu1 %978 }
 0x5d6   : > { %1021 = vst.msk [vmem:[#allocation3 + $0x8] sm:$0xff] %vm456_vm1, %v1017_v49  ;;  %v984_v51 = vadd.f32 %v979_v50, %v972_v48 }
 0x5d8   : > { %988 = vrot.lane.b32.xlu1 %v984_v51, %s3056_s19 }
 0x5d9   : > { %v981_v53 = vpop.permute.xlu0 %980  ;;  %v3436_v55 = vld [vmem:[#allocation3] sm:$0xff] }
 0x5da   : > { %v985_v54 = vadd.f32 %v981_v53, %v973_v52 }
 0x5dc   : > { %990 = vrot.lane.b32.xlu0 %v985_v54, %s3056_s19 }
 0x5dd   : > { %v3438_v32 = vld [vmem:[#allocation3 + $0x8] sm:$0xff] }
 0x5de   : > { %v1065_v38 = vpack.c.bf16 %v3438_v32, %v3436_v55 }
 0x5e0   : > { %2584 = vmatmul.mubr.msk.bf16.vlgmr.msra.gmra.mxu1 %vm456_vm1, %v1065_v38 }
 0x5e1   : > { %2588 = vmatpush3.bf16.msra.mxu1 %v3286_v18  ;;  %2591 = vmatprep.mubr.msk.bf16.mxu1 %vm3052_vm2, %v3051_v17 }
 0x5e2   : > { %2589 = vmatprep.subr.bf16.mxu1 %v3051_v17 }
 0x5e5   : > { %2590 = vmatpush3.bf16.msra.mxu1 %v3299_v20 }
 0x5e6   : > { %2603 = vmatprep.subr.bf16.mxu1 %v3051_v17 }
 0x64a   : > { %v989_v56 = vpop.permute.xlu1 %988 }
 0x64b   : > { %994 = vst.msk [vmem:[#allocation4] sm:$0xff] %vm456_vm1, %v989_v56 }
 0x64e   : > { %v991_v57 = vpop.permute.xlu0 %990 }
 0x64f   : > { %995 = vst.msk [vmem:[#allocation4 + $0x8] sm:$0xff] %vm456_vm1, %v991_v57 }
 0x652   : > { %v1126_v8 = vld [vmem:[#allocation4] sm:$0xff] }
 0x656   : > { %v1127_v9 = vld [vmem:[#allocation4 + $0x8] sm:$0xff] }
 0x6a0   : > { %v1103_v63 = vpop.f32.mrf.mxu1 }
 0x6a1   : > { %v1110_v0 = vadd.f32 %v1103_v63, %v578_v61 }
 0x6a2   : > { %v2585_v1 = vpop.f32.mrf.mxu1 }
 0x6a3   : > { %2756 = vtanh.f32 %v1110_v0  ;;  %v2472_v10 = vmul.f32 -1.442695, %v1110_v0 }
 0x6a4   : > { %v1106_v3 = vpop.f32.mrf.mxu1 }
 0x6a5   : > { %v1111_v4 = vadd.f32 %v1106_v3, %v581_v2 }
 0x6a6   : > { %v2586_v5 = vpop.f32.mrf.mxu1 }
 0x6a7   : > { %2758 = vtanh.f32 %v1111_v4  ;;  %v2473_v11 = vmul.f32 -1.442695, %v1111_v4 }
 0x6a8   : > { %2760 = vpow2.f32 %v2472_v10 }
 0x6a9   : > { %2762 = vpow2.f32 %v2473_v11  ;;  %v586_v11 = vadd.f32 %v3451_v58, %v3337_v33 }
 0x6b0   : > { %v2757_v6 = vpop.eup %2756 }
 0x6b1   : > { %1140 = vrot.lane.b32.xlu1 %v2757_v6, %s3053_s24 }
 0x6b4   : > { %v2759_v7 = vpop.eup %2758 }
 0x6b5   : > { %1142 = vrot.lane.b32.xlu0 %v2759_v7, %s3053_s24  ;;  %1130 = vrot.lane.b32.xlu1 %v1126_v8, %s3053_s24  ;;  %v2761_v12 = vpop.eup %2760 }
 0x6b6   : > { %v1118_v13 = vadd.f32 1.0, %v2761_v12  ;;  %v2763_v14 = vpop.eup %2762 }
 0x6b7   : > { %v1119_v15 = vadd.f32 1.0, %v2763_v14 }
 0x6b8   : > { %2764 = vrcp.f32 %v1118_v13 }
 0x6b9   : > { %1132 = vrot.lane.b32.xlu0 %v1127_v9, %s3053_s24  ;;  %2766 = vrcp.f32 %v1119_v15  ;;  %v589_v15 = vadd.f32 %v3453_v60, %v3337_v33 }
 0x6c5   : > { %v2765_v19 = vpop.eup %2764 }
 0x6c6   : > { %v2767_v23 = vpop.eup %2766 }
 0x723   : > { %v1141_v21 = vpop.permute.xlu1 %1140 }
 0x724   : > { %v1146_v22 = vmul.f32 %v2765_v19, %v1141_v21 }
 0x726   : > { %1150 = vrot.lane.b32.xlu1 %v1146_v22, %s3053_s24 }
 0x727   : > { %v1143_v25 = vpop.permute.xlu0 %1142  ;;  %v1131_v30 = vpop.permute.xlu1 %1130 }
 0x728   : > { %v1147_v27 = vmul.f32 %v2767_v23, %v1143_v25  ;;  %v1136_v34 = vmul.f32 %v2765_v19, %v1131_v30 }
 0x72a   : > { %1152 = vrot.lane.b32.xlu0 %v1147_v27, %s3053_s24  ;;  %1050 = vperm.xlu1 %2719, %v2469_v26  }
 0x72b   : > { %v1133_v35 = vpop.permute.xlu0 %1132 }
 0x72c   : > { %v1137_v39 = vmul.f32 %v2767_v23, %v1133_v35 }
 0x72e   : > { %1055 = vperm.xlu0 %2718, %v2470_v28  }
 0x798   : > { %v1151_v36 = vpop.permute.xlu1 %1150 }
 0x799   : > { %v1156_v37 = vadd.f32 %v1151_v36, %v1136_v34 }
 0x79b   : > { %2768 = vtanh.f32 %v1156_v37 }
 0x79c   : > { %v1153_v40 = vpop.permute.xlu0 %1152 }
 0x79d   : > { %v1157_v31 = vadd.f32 %v1153_v40, %v1137_v39 }
 0x79f   : > { %2770 = vtanh.f32 %v1157_v31 }
 0x7a5   : > { %v1051_v41 = vpop.permute.xlu1 %1050 }
 0x7a6   : > { %v1058_v43 = vsub.f32 1.0, %v1051_v41  ;;  %v1170_v63 = vmul.f32 %v1156_v37, %v1051_v41 }
 0x7a8   : > { %v2769_v44 = vpop.eup %2768  ;;  %v1198_v47 = vmul.f32 %v3436_v55, %v1058_v43  ;;  %v1172_v61 = vmul.f32 %v1126_v8, %v1058_v43 }
 0x7a9   : > { %v1056_v45 = vpop.permute.xlu0 %1055  ;;  %1162 = vrot.lane.b32.xlu1 %v2769_v44, %s3053_s24  ;;  %v2475_v44 = vld [vmem:[%s3931_s1 + $0x38] sm:$0xff] }
 0x7aa   : > { %v1059_v46 = vsub.f32 1.0, %v1056_v45  ;;  %v1171_v3 = vmul.f32 %v1157_v31, %v1056_v45 }
 0x7ac   : > { %v2771_v48 = vpop.eup %2770  ;;  %v1199_v49 = vmul.f32 %v3438_v32, %v1059_v46  ;;  %v1173_v32 = vmul.f32 %v1127_v9, %v1059_v46 }
 0x7ad   : > { %1164 = vrot.lane.b32.xlu0 %v2771_v48, %s3053_s24  ;;  %1202 = vrot.lane.b32.xlu1 %v1198_v47, %s3055_s10 }
 0x7b1   : > { %1204 = vrot.lane.b32.xlu0 %v1199_v49, %s3055_s10 }
 0x81b   : > { %v1163_v50 = vpop.permute.xlu1 %1162 }
 0x81c   : > { %v1168_v51 = vmul.f32 %v2765_v19, %v1163_v50 }
 0x81e   : > { %v3475_v52 = vmul.f32 %v1168_v51, %v1051_v41  ;;  %v2474_v41 = vld [vmem:[%s3931_s1 + $0x30] sm:$0xff] }
 0x81f   : > { %v1165_v53 = vpop.permute.xlu0 %1164  ;;  %v1203_v54 = vpop.permute.xlu1 %1202 }
 0x820   : > { %v1169_v38 = vmul.f32 %v2767_v23, %v1165_v53  ;;  %v1208_v56 = vadd.f32 %v1203_v54, %v3475_v52 }
 0x822   : > { %1212 = vrot.lane.b32.xlu1 %v1208_v56, %s3055_s10  ;;  %v3479_v55 = vmul.f32 %v1169_v38, %v1056_v45 }
 0x823   : > { %v1205_v57 = vpop.permute.xlu0 %1204 }
 0x824   : > { %v1209_v59 = vadd.f32 %v1205_v57, %v3479_v55 }
 0x826   : > { %1214 = vrot.lane.b32.xlu0 %v1209_v59, %s3055_s10  ;;  %1176 = vrot.lane.b32.xlu1 %v1172_v61, %s3053_s24  ;;  %v3527_v59 = vld [vmem:[#allocation10 + $0x40] sm:$0xff]  ;;  %v3529_v61 = vld [vmem:[#allocation10 + $0x48] sm:$0xff] }
 0x82a   : > { %1178 = vrot.lane.b32.xlu0 %v1173_v32, %s3053_s24  ;;  %v3531_v32 = vld [vmem:[#allocation10 + $0x50] sm:$0xff] }
 0x894   : > { %v1213_v62 = vpop.permute.xlu1 %1212 }
 0x895   : > { %1218 = vst.msk [vmem:[#allocation3] sm:$0xff] %vm456_vm1, %v1213_v62 }
 0x898   : > { %v1215_v0 = vpop.permute.xlu0 %1214  ;;  %v1177_v1 = vpop.permute.xlu1 %1176 }
 0x899   : > { %1219 = vst.msk [vmem:[#allocation3 + $0x8] sm:$0xff] %vm456_vm1, %v1215_v0  ;;  %v1182_v2 = vadd.f32 %v1177_v1, %v1170_v63  ;;  %v481_v0 = vpack.c.bf16 %v3529_v61, %v3527_v59  ;;  %v3536_v1 = vld [vmem:[#allocation10 + $0x58] sm:$0xff] }
 0x89b   : > { %1186 = vrot.lane.b32.xlu1 %v1182_v2, %s3056_s19  ;;  %v3538_v2 = vld [vmem:[#allocation10 + $0x60] sm:$0xff]  ;;  %2555 = vmatprep.mubr.msk.bf16.mxu0 %vm456_vm1, %v481_v0 }
 0x89c   : > { %v1179_v4 = vpop.permute.xlu0 %1178  ;;  %v3489_v6 = vld [vmem:[#allocation3] sm:$0xff] }
 0x89d   : > { %v1183_v5 = vadd.f32 %v1179_v4, %v1171_v3  ;;  %v3540_v3 = vld [vmem:[#allocation10 + $0x68] sm:$0xff] }
 0x89f   : > { %1188 = vrot.lane.b32.xlu0 %v1183_v5, %s3056_s19  ;;  %v482_v5 = vpack.c.bf16 %v3536_v1, %v3531_v32 }
 0x8a0   : > { %v3491_v7 = vld [vmem:[#allocation3 + $0x8] sm:$0xff] }
 0x8a1   : > { %v1263_v8 = vpack.c.bf16 %v3491_v7, %v3489_v6  ;;  %2556 = vmatmul.mubr.msk.bf16.gmra.mxu0 %vm456_vm1, %v482_v5 }
 0x8a3   : > { %2592 = vmatmul.mubr.msk.bf16.vlgmr.msra.gmra.mxu1 %vm456_vm1, %v1263_v8  ;;  %v483_v8 = vpack.c.bf16 %v3540_v3, %v3538_v2 }
 0x8a4   : > { %2604 = vmatpush3.bf16.msra.mxu1 %v3286_v18  ;;  %2607 = vmatprep.mubr.msk.bf16.mxu1 %vm3052_vm2, %v3051_v17 }
 0x8a5   : > { %2605 = vmatprep.subr.bf16.mxu1 %v3051_v17  ;;  %2559 = vmatprep.mubr.msk.bf16.mxu0 %vm456_vm1, %v483_v8 }
 0x8a8   : > { %2606 = vmatpush3.bf16.msra.mxu1 %v3299_v20 }
 0x8a9   : > { %2619 = vmatprep.subr.bf16.mxu1 %v3051_v17 }
 0x90d   : > { %v1187_v9 = vpop.permute.xlu1 %1186 }
 0x90e   : > { %1192 = vst.msk [vmem:[#allocation4] sm:$0xff] %vm456_vm1, %v1187_v9  ;;  %v3553_v9 = vld [vmem:[#allocation10 + $0x70] sm:$0xff] }
 0x911   : > { %v1189_v10 = vpop.permute.xlu0 %1188 }
 0x912   : > { %1193 = vst.msk [vmem:[#allocation4 + $0x8] sm:$0xff] %vm456_vm1, %v1189_v10  ;;  %v3555_v10 = vld [vmem:[#allocation10 + $0x78] sm:$0xff] }
 0x915   : > { %v3509_v26 = vld [vmem:[#allocation4] sm:$0xff] }
 0x919   : > { %v3514_v58 = vld [vmem:[#allocation4 + $0x8] sm:$0xff] }
 0x963   : > { %v1301_v12 = vpop.f32.mrf.mxu1 }
 0x964   : > { %v1308_v13 = vadd.f32 %v1301_v12, %v586_v11  ;;  %v484_v11 = vpack.c.bf16 %v3555_v10, %v3553_v9 }
 0x965   : > { %v2593_v14 = vpop.f32.mrf.mxu1 }
 0x966   : > { %2772 = vtanh.f32 %v1308_v13  ;;  %v2477_v60 = vmul.f32 -1.442695, %v1308_v13  ;;  %2560 = vmatmul.mubr.msk.bf16.gmra.mxu0 %vm456_vm1, %v484_v11 }
 0x967   : > { %v1304_v19 = vpop.f32.mrf.mxu1  ;;  %2599 = vmatprep.mubr.msk.bf16.mxu0 %vm3052_vm2, %v3051_v17 }
 0x968   : > { %v1309_v21 = vadd.f32 %v1304_v19, %v589_v15 }
 0x969   : > { %v2594_v22 = vpop.f32.mrf.mxu1 }
 0x96a   : > { %2774 = vtanh.f32 %v1309_v21  ;;  %v2478_v27 = vmul.f32 -1.442695, %v1309_v21 }
 0x96b   : > { %2776 = vpow2.f32 %v2477_v60 }
 0x96c   : > { %2778 = vpow2.f32 %v2478_v27 }
 0x973   : > { %v2773_v23 = vpop.eup %2772 }
 0x974   : > { %1338 = vrot.lane.b32.xlu1 %v2773_v23, %s3053_s24 }
 0x977   : > { %v2775_v25 = vpop.eup %2774 }
 0x978   : > { %1340 = vrot.lane.b32.xlu0 %v2775_v25, %s3053_s24  ;;  %1328 = vrot.lane.b32.xlu1 %v3509_v26, %s3053_s24  ;;  %v2777_v28 = vpop.eup %2776 }
 0x979   : > { %v1316_v30 = vadd.f32 1.0, %v2777_v28  ;;  %v2779_v34 = vpop.eup %2778 }
 0x97a   : > { %v1317_v35 = vadd.f32 1.0, %v2779_v34 }
 0x97b   : > { %2780 = vrcp.f32 %v1316_v30 }
 0x97c   : > { %1330 = vrot.lane.b32.xlu0 %v3514_v58, %s3053_s24  ;;  %2782 = vrcp.f32 %v1317_v35 }
 0x988   : > { %v2781_v36 = vpop.eup %2780 }
 0x989   : > { %v2783_v40 = vpop.eup %2782 }
 0x9e6   : > { %v1339_v37 = vpop.permute.xlu1 %1338 }
 0x9e7   : > { %v1344_v39 = vmul.f32 %v2781_v36, %v1339_v37 }
 0x9e9   : > { %1348 = vrot.lane.b32.xlu1 %v1344_v39, %s3053_s24 }
 0x9ea   : > { %v1341_v31 = vpop.permute.xlu0 %1340  ;;  %v1329_v45 = vpop.permute.xlu1 %1328 }
 0x9eb   : > { %v1345_v43 = vmul.f32 %v2783_v40, %v1341_v31  ;;  %v1334_v46 = vmul.f32 %v2781_v36, %v1329_v45 }
 0x9ed   : > { %1350 = vrot.lane.b32.xlu0 %v1345_v43, %s3053_s24  ;;  %1248 = vperm.xlu1 %2719, %v2474_v41  }
 0x9ee   : > { %v1331_v47 = vpop.permute.xlu0 %1330 }
 0x9ef   : > { %v1335_v50 = vmul.f32 %v2783_v40, %v1331_v47 }
 0x9f1   : > { %1253 = vperm.xlu0 %2718, %v2475_v44   ;;  %v3592_v44 = vpop.f32.mrf.mxu0 }
 0x9f3   : > { %v593_v45 = vpop.f32.mrf.mxu0 }
 0xa5b   : > { %v1349_v48 = vpop.permute.xlu1 %1348 }
 0xa5c   : > { %v1354_v49 = vadd.f32 %v1349_v48, %v1334_v46  ;;  %v3594_v46 = vpop.f32.mrf.mxu0 }
 0xa5e   : > { %2784 = vtanh.f32 %v1354_v49  ;;  %v596_v47 = vpop.f32.mrf.mxu0 }
 0xa5f   : > { %v1351_v51 = vpop.permute.xlu0 %1350 }
 0xa60   : > { %v1355_v53 = vadd.f32 %v1351_v51, %v1335_v50 }
 0xa62   : > { %2786 = vtanh.f32 %v1355_v53 }
 0xa68   : > { %v1249_v54 = vpop.permute.xlu1 %1248 }
 0xa69   : > { %v1256_v38 = vsub.f32 1.0, %v1249_v54  ;;  %v1368_v30 = vmul.f32 %v1354_v49, %v1249_v54 }
 0xa6b   : > { %v2785_v56 = vpop.eup %2784  ;;  %v1396_v63 = vmul.f32 %v3489_v6, %v1256_v38  ;;  %v1370_v60 = vmul.f32 %v3509_v26, %v1256_v38  ;;  %v597_v38 = vadd.f32 %v3337_v33, %v596_v47 }
 0xa6c   : > { %v1254_v57 = vpop.permute.xlu0 %1253  ;;  %1360 = vrot.lane.b32.xlu1 %v2785_v56, %s3053_s24 }
 0xa6d   : > { %v1257_v62 = vsub.f32 1.0, %v1254_v57  ;;  %v1369_v26 = vmul.f32 %v1355_v53, %v1254_v57 }
 0xa6f   : > { %v2787_v4 = vpop.eup %2786  ;;  %v1397_v6 = vmul.f32 %v3491_v7, %v1257_v62  ;;  %v1371_v27 = vmul.f32 %v3514_v58, %v1257_v62 }
 0xa70   : > { %1362 = vrot.lane.b32.xlu0 %v2787_v4, %s3053_s24  ;;  %1400 = vrot.lane.b32.xlu1 %v1396_v63, %s3055_s10 }
 0xa74   : > { %1402 = vrot.lane.b32.xlu0 %v1397_v6, %s3055_s10 }
 0xade   : > { %v1361_v12 = vpop.permute.xlu1 %1360 }
 0xadf   : > { %v1366_v7 = vmul.f32 %v2781_v36, %v1361_v12 }
 0xae1   : > { %v3562_v13 = vmul.f32 %v1366_v7, %v1249_v54 }
 0xae2   : > { %v1363_v14 = vpop.permute.xlu0 %1362  ;;  %v1401_v15 = vpop.permute.xlu1 %1400 }
 0xae3   : > { %v1367_v19 = vmul.f32 %v2783_v40, %v1363_v14  ;;  %v1406_v21 = vadd.f32 %v1401_v15, %v3562_v13 }
 0xae5   : > { %1410 = vrot.lane.b32.xlu1 %v1406_v21, %s3055_s10  ;;  %v3566_v22 = vmul.f32 %v1367_v19, %v1254_v57 }
 0xae6   : > { %v1403_v23 = vpop.permute.xlu0 %1402 }
 0xae7   : > { %v1407_v25 = vadd.f32 %v1403_v23, %v3566_v22 }
 0xae9   : > { %1412 = vrot.lane.b32.xlu0 %v1407_v25, %s3055_s10  ;;  %1374 = vrot.lane.b32.xlu1 %v1370_v60, %s3053_s24  ;;  %v2479_v25 = vld [vmem:[%s3931_s1 + $0x40] sm:$0xff] }
 0xaed   : > { %1376 = vrot.lane.b32.xlu0 %v1371_v27, %s3053_s24  ;;  %v2480_v27 = vld [vmem:[%s3931_s1 + $0x48] sm:$0xff] }
 0xb57   : > { %v1411_v28 = vpop.permute.xlu1 %1410 }
 0xb58   : > { %1416 = vst.msk [vmem:[#allocation3] sm:$0xff] %vm456_vm1, %v1411_v28 }
 0xb5b   : > { %v1413_v34 = vpop.permute.xlu0 %1412  ;;  %v1375_v35 = vpop.permute.xlu1 %1374 }
 0xb5c   : > { %1417 = vst.msk [vmem:[#allocation3 + $0x8] sm:$0xff] %vm456_vm1, %v1413_v34  ;;  %v1380_v36 = vadd.f32 %v1375_v35, %v1368_v30 }
 0xb5e   : > { %1384 = vrot.lane.b32.xlu1 %v1380_v36, %s3056_s19 }
 0xb5f   : > { %v1377_v37 = vpop.permute.xlu0 %1376  ;;  %v3578_v40 = vld [vmem:[#allocation3] sm:$0xff] }
 0xb60   : > { %v1381_v39 = vadd.f32 %v1377_v37, %v1369_v26 }
 0xb62   : > { %1386 = vrot.lane.b32.xlu0 %v1381_v39, %s3056_s19 }
 0xb63   : > { %v3580_v58 = vld [vmem:[#allocation3 + $0x8] sm:$0xff] }
 0xb64   : > { %v1461_v31 = vpack.c.bf16 %v3580_v58, %v3578_v40 }
 0xb66   : > { %2600 = vmatmul.mubr.msk.bf16.vlgmr.msra.gmra.mxu0 %vm456_vm1, %v1461_v31 }
 0xb67   : > { %2612 = vmatpush3.bf16.msra.mxu0 %v3286_v18  ;;  %2615 = vmatprep.mubr.msk.bf16.mxu0 %vm3052_vm2, %v3051_v17  ;;  %v3596_v18 = vpop.f32.mrf.mxu0 }
 0xb68   : > { %2613 = vmatprep.subr.bf16.mxu0 %v3051_v17 }
 0xb69   : > { %v3598_v48 = vpop.f32.mrf.mxu0 }
 0xb6b   : > { %2614 = vmatpush3.bf16.msra.mxu0 %v3299_v20  ;;  %v3600_v49 = vpop.f32.mrf.mxu0  ;;  %v594_v20 = vadd.f32 %v3337_v33, %v593_v45 }
 0xb6d   : > { %v3602_v50 = vpop.f32.mrf.mxu0 }
 0xbd0   : > { %v1385_v41 = vpop.permute.xlu1 %1384 }
 0xbd1   : > { %1390 = vst.msk [vmem:[#allocation4] sm:$0xff] %vm456_vm1, %v1385_v41 }
 0xbd4   : > { %v1387_v43 = vpop.permute.xlu0 %1386 }
 0xbd5   : > { %1391 = vst.msk [vmem:[#allocation4 + $0x8] sm:$0xff] %vm456_vm1, %v1387_v43 }
 0xbd8   : > { %v1522_v4 = vld [vmem:[#allocation4] sm:$0xff] }
 0xbdc   : > { %v1523_v5 = vld [vmem:[#allocation4 + $0x8] sm:$0xff] }
 0xc26   : > { %v1499_v51 = vpop.f32.mrf.mxu0 }
 0xc27   : > { %v1506_v53 = vadd.f32 %v1499_v51, %v594_v20 }
 0xc28   : > { %v2601_v54 = vpop.f32.mrf.mxu0 }
 0xc29   : > { %2788 = vtanh.f32 %v1506_v53  ;;  %v2482_v8 = vmul.f32 -1.442695, %v1506_v53 }
 0xc2a   : > { %v1502_v56 = vpop.f32.mrf.mxu0 }
 0xc2b   : > { %v1507_v57 = vadd.f32 %v1502_v56, %v597_v38 }
 0xc2c   : > { %v2602_v62 = vpop.f32.mrf.mxu0 }
 0xc2d   : > { %2790 = vtanh.f32 %v1507_v57  ;;  %v2483_v33 = vmul.f32 -1.442695, %v1507_v57 }
 0xc2e   : > { %2792 = vpow2.f32 %v2482_v8 }
 0xc2f   : > { %2794 = vpow2.f32 %v2483_v33 }
 0xc36   : > { %v2789_v63 = vpop.eup %2788 }
 0xc37   : > { %1536 = vrot.lane.b32.xlu1 %v2789_v63, %s3053_s24 }
 0xc3a   : > { %v2791_v0 = vpop.eup %2790 }
 0xc3b   : > { %1538 = vrot.lane.b32.xlu0 %v2791_v0, %s3053_s24  ;;  %1526 = vrot.lane.b32.xlu1 %v1522_v4, %s3053_s24  ;;  %v2793_v6 = vpop.eup %2792 }
 0xc3c   : > { %v1514_v11 = vadd.f32 1.0, %v2793_v6  ;;  %v2795_v12 = vpop.eup %2794 }
 0xc3d   : > { %v1515_v7 = vadd.f32 1.0, %v2795_v12 }
 0xc3e   : > { %2796 = vrcp.f32 %v1514_v11 }
 0xc3f   : > { %1528 = vrot.lane.b32.xlu0 %v1523_v5, %s3053_s24  ;;  %2798 = vrcp.f32 %v1515_v7 }
 0xc4b   : > { %v2797_v14 = vpop.eup %2796 }
 0xc4c   : > { %v2799_v21 = vpop.eup %2798 }
 0xca9   : > { %v1537_v15 = vpop.permute.xlu1 %1536 }
 0xcaa   : > { %v1542_v19 = vmul.f32 %v2797_v14, %v1537_v15 }
 0xcac   : > { %1546 = vrot.lane.b32.xlu1 %v1542_v19, %s3053_s24 }
 0xcad   : > { %v1539_v23 = vpop.permute.xlu0 %1538  ;;  %v1527_v28 = vpop.permute.xlu1 %1526 }
 0xcae   : > { %v1543_v60 = vmul.f32 %v2799_v21, %v1539_v23  ;;  %v1532_v30 = vmul.f32 %v2797_v14, %v1527_v28 }
 0xcb0   : > { %1548 = vrot.lane.b32.xlu0 %v1543_v60, %s3053_s24  ;;  %1446 = vperm.xlu1 %2719, %v2479_v25   ;;  %v2852_v60 = vld [vmem:[%s3205_s9 + $0x8] sm:$0xff]  }
 0xcb1   : > { %v1529_v34 = vpop.permute.xlu0 %1528 }
 0xcb2   : > { %v1533_v26 = vmul.f32 %v2799_v21, %v1529_v34  ;;  %v3653_v34 = vld [vmem:[%s3216_s17] ss:$0 sm:$0xff] }
 0xcb4   : > { %1451 = vperm.xlu0 %2718, %v2480_v27   ;;  %v2853_v27 = vld [vmem:[%s3205_s9] sm:$0xff]   ;;  %s2250_s9 = sshll.u32 %s3059_s21, 4  ;;  %s3870_s9 = int_to_ptr.vmem [resolvable:$true] %s2250_s9 }
 0xd1e   : > { %v1547_v35 = vpop.permute.xlu1 %1546 }
 0xd1f   : > { %v1552_v36 = vadd.f32 %v1547_v35, %v1532_v30  ;;  %v602_v35 = vadd.f32 %v3653_v34, %v3592_v44 }
 0xd21   : > { %2800 = vtanh.f32 %v1552_v36 }
 0xd22   : > { %v1549_v37 = vpop.permute.xlu0 %1548 }
 0xd23   : > { %v1553_v39 = vadd.f32 %v1549_v37, %v1533_v26 }
 0xd25   : > { %2802 = vtanh.f32 %v1553_v39 }
 0xd2b   : > { %v1447_v31 = vpop.permute.xlu1 %1446 }
 0xd2c   : > { %v1454_v41 = vsub.f32 1.0, %v1447_v31  ;;  %v1566_v12 = vmul.f32 %v1552_v36, %v1447_v31 }
 0xd2e   : > { %v2801_v43 = vpop.eup %2800  ;;  %v1594_v20 = vmul.f32 %v3578_v40, %v1454_v41  ;;  %v1568_v6 = vmul.f32 %v1522_v4, %v1454_v41 }
 0xd2f   : > { %v1452_v45 = vpop.permute.xlu0 %1451  ;;  %1558 = vrot.lane.b32.xlu1 %v2801_v43, %s3053_s24 }
 0xd30   : > { %v1455_v47 = vsub.f32 1.0, %v1452_v45  ;;  %v1567_v4 = vmul.f32 %v1553_v39, %v1452_v45  ;;  %v605_v39 = vadd.f32 %v3653_v34, %v3594_v46 }
 0xd32   : > { %v2803_v51 = vpop.eup %2802  ;;  %v1595_v53 = vmul.f32 %v3580_v58, %v1455_v47  ;;  %v1569_v58 = vmul.f32 %v1523_v5, %v1455_v47 }
 0xd33   : > { %1560 = vrot.lane.b32.xlu0 %v2803_v51, %s3053_s24  ;;  %1598 = vrot.lane.b32.xlu1 %v1594_v20, %s3055_s10 }
 0xd37   : > { %1600 = vrot.lane.b32.xlu0 %v1595_v53, %s3055_s10 }
 0xda1   : > { %v1559_v54 = vpop.permute.xlu1 %1558 }
 0xda2   : > { %v1564_v38 = vmul.f32 %v2797_v14, %v1559_v54 }
 0xda4   : > { %v3624_v56 = vmul.f32 %v1564_v38, %v1447_v31 }
 0xda5   : > { %v1561_v57 = vpop.permute.xlu0 %1560  ;;  %v1599_v62 = vpop.permute.xlu1 %1598 }
 0xda6   : > { %v1565_v63 = vmul.f32 %v2799_v21, %v1561_v57  ;;  %v1604_v0 = vadd.f32 %v1599_v62, %v3624_v56 }
 0xda8   : > { %1608 = vrot.lane.b32.xlu1 %v1604_v0, %s3055_s10  ;;  %v3628_v40 = vmul.f32 %v1565_v63, %v1452_v45 }
 0xda9   : > { %v1601_v8 = vpop.permute.xlu0 %1600 }
 0xdaa   : > { %v1605_v33 = vadd.f32 %v1601_v8, %v3628_v40 }
 0xdac   : > { %1610 = vrot.lane.b32.xlu0 %v1605_v33, %s3055_s10  ;;  %1572 = vrot.lane.b32.xlu1 %v1568_v6, %s3053_s24  ;;  %v2484_v33 = vld [vmem:[%s3931_s1 + $0x50] sm:$0xff] }
 0xdb0   : > { %1574 = vrot.lane.b32.xlu0 %v1569_v58, %s3053_s24  ;;  %v2485_v58 = vld [vmem:[%s3931_s1 + $0x58] sm:$0xff] }
 0xe1a   : > { %v1609_v11 = vpop.permute.xlu1 %1608 }
 0xe1b   : > { %1614 = vst.msk [vmem:[#allocation3] sm:$0xff] %vm456_vm1, %v1609_v11 }
 0xe1e   : > { %v1611_v7 = vpop.permute.xlu0 %1610  ;;  %v1573_v14 = vpop.permute.xlu1 %1572 }
 0xe1f   : > { %1615 = vst.msk [vmem:[#allocation3 + $0x8] sm:$0xff] %vm456_vm1, %v1611_v7  ;;  %v1578_v15 = vadd.f32 %v1573_v14, %v1566_v12 }
 0xe21   : > { %1582 = vrot.lane.b32.xlu1 %v1578_v15, %s3056_s19 }
 0xe22   : > { %v1575_v19 = vpop.permute.xlu0 %1574  ;;  %v3638_v5 = vld [vmem:[#allocation3] sm:$0xff] }
 0xe23   : > { %v1579_v21 = vadd.f32 %v1575_v19, %v1567_v4 }
 0xe25   : > { %1584 = vrot.lane.b32.xlu0 %v1579_v21, %s3056_s19 }
 0xe26   : > { %v3640_v23 = vld [vmem:[#allocation3 + $0x8] sm:$0xff] }
 0xe27   : > { %v1659_v25 = vpack.c.bf16 %v3640_v23, %v3638_v5 }
 0xe29   : > { %2608 = vmatmul.mubr.msk.bf16.vlgmr.msra.gmra.mxu1 %vm456_vm1, %v1659_v25 }
 0xe2a   : > { %2620 = vmatpush3.bf16.msra.mxu1 %v2852_v60  ;;  %2623 = vmatprep.mubr.msk.bf16.mxu1 %vm3052_vm2, %v3051_v17 }
 0xe2b   : > { %2621 = vmatprep.subr.bf16.mxu1 %v3051_v17 }
 0xe2e   : > { %2622 = vmatpush3.bf16.msra.mxu1 %v2853_v27 }
 0xe93   : > { %v1583_v28 = vpop.permute.xlu1 %1582 }
 0xe94   : > { %1588 = vst.msk [vmem:[#allocation4] sm:$0xff] %vm456_vm1, %v1583_v28 }
 0xe97   : > { %v1585_v30 = vpop.permute.xlu0 %1584 }
 0xe98   : > { %1589 = vst.msk [vmem:[#allocation4 + $0x8] sm:$0xff] %vm456_vm1, %v1585_v30 }
 0xe9b   : > { %v1720_v47 = vld [vmem:[#allocation4] sm:$0xff] }
 0xe9f   : > { %v1721_v44 = vld [vmem:[#allocation4 + $0x8] sm:$0xff] }
 0xee9   : > { %v1697_v36 = vpop.f32.mrf.mxu1 }
 0xeea   : > { %v1704_v26 = vadd.f32 %v1697_v36, %v602_v35 }
 0xeeb   : > { %v2609_v37 = vpop.f32.mrf.mxu1 }
 0xeec   : > { %2804 = vtanh.f32 %v1704_v26  ;;  %v2487_v20 = vmul.f32 -1.442695, %v1704_v26 }
 0xeed   : > { %v1700_v17 = vpop.f32.mrf.mxu1 }
 0xeee   : > { %v1705_v31 = vadd.f32 %v1700_v17, %v605_v39 }
 0xeef   : > { %v2610_v41 = vpop.f32.mrf.mxu1 }
 0xef0   : > { %2806 = vtanh.f32 %v1705_v31  ;;  %v2488_v46 = vmul.f32 -1.442695, %v1705_v31 }
 0xef1   : > { %2808 = vpow2.f32 %v2487_v20 }
 0xef2   : > { %2810 = vpow2.f32 %v2488_v46 }
 0xef9   : > { %v2805_v43 = vpop.eup %2804 }
 0xefa   : > { %1734 = vrot.lane.b32.xlu1 %v2805_v43, %s3053_s24 }
 0xefd   : > { %v2807_v45 = vpop.eup %2806 }
 0xefe   : > { %1736 = vrot.lane.b32.xlu0 %v2807_v45, %s3053_s24  ;;  %1724 = vrot.lane.b32.xlu1 %v1720_v47, %s3053_s24  ;;  %v2809_v51 = vpop.eup %2808 }
 0xeff   : > { %v1712_v53 = vadd.f32 1.0, %v2809_v51  ;;  %v2811_v54 = vpop.eup %2810 }
 0xf00   : > { %v1713_v38 = vadd.f32 1.0, %v2811_v54 }
 0xf01   : > { %2812 = vrcp.f32 %v1712_v53 }
 0xf02   : > { %1726 = vrot.lane.b32.xlu0 %v1721_v44, %s3053_s24  ;;  %2814 = vrcp.f32 %v1713_v38 }
 0xf0e   : > { %v2813_v57 = vpop.eup %2812 }
 0xf0f   : > { %v2815_v0 = vpop.eup %2814 }
 0xf6c   : > { %v1735_v62 = vpop.permute.xlu1 %1734 }
 0xf6d   : > { %v1740_v63 = vmul.f32 %v2813_v57, %v1735_v62 }
 0xf6f   : > { %1744 = vrot.lane.b32.xlu1 %v1740_v63, %s3053_s24 }
 0xf70   : > { %v1737_v8 = vpop.permute.xlu0 %1736  ;;  %v1725_v11 = vpop.permute.xlu1 %1724 }
 0xf71   : > { %v1741_v6 = vmul.f32 %v2815_v0, %v1737_v8  ;;  %v1730_v12 = vmul.f32 %v2813_v57, %v1725_v11  ;;  %v610_v11 = vadd.f32 %v3653_v34, %v3598_v48 }
 0xf73   : > { %1746 = vrot.lane.b32.xlu0 %v1741_v6, %s3053_s24  ;;  %1644 = vperm.xlu1 %2719, %v2484_v33  }
 0xf74   : > { %v1727_v7 = vpop.permute.xlu0 %1726 }
 0xf75   : > { %v1731_v4 = vmul.f32 %v2815_v0, %v1727_v7 }
 0xf77   : > { %1649 = vperm.xlu0 %2718, %v2485_v58  }
 0xfe1   : > { %v1745_v14 = vpop.permute.xlu1 %1744 }
 0xfe2   : > { %v1750_v15 = vadd.f32 %v1745_v14, %v1730_v12 }
 0xfe4   : > { %2816 = vtanh.f32 %v1750_v15 }
 0xfe5   : > { %v1747_v19 = vpop.permute.xlu0 %1746 }
 0xfe6   : > { %v1751_v21 = vadd.f32 %v1747_v19, %v1731_v4 }
 0xfe8   : > { %2818 = vtanh.f32 %v1751_v21 }
 0xfee   : > { %v1645_v25 = vpop.permute.xlu1 %1644 }
 0xfef   : > { %v1652_v60 = vsub.f32 1.0, %v1645_v25  ;;  %v1764_v54 = vmul.f32 %v1750_v15, %v1645_v25  ;;  %v613_v15 = vadd.f32 %v3653_v34, %v3602_v50 }
 0xff1   : > { %v2817_v27 = vpop.eup %2816  ;;  %v1792_v30 = vmul.f32 %v3638_v5, %v1652_v60  ;;  %v1766_v46 = vmul.f32 %v1720_v47, %v1652_v60 }
 0xff2   : > { %v1650_v28 = vpop.permute.xlu0 %1649  ;;  %1756 = vrot.lane.b32.xlu1 %v2817_v27, %s3053_s24 }
 0xff3   : > { %v1653_v35 = vsub.f32 1.0, %v1650_v28  ;;  %v1765_v47 = vmul.f32 %v1751_v21, %v1650_v28 }
 0xff5   : > { %v2819_v36 = vpop.eup %2818  ;;  %v1793_v26 = vmul.f32 %v3640_v23, %v1653_v35  ;;  %v1767_v23 = vmul.f32 %v1721_v44, %v1653_v35 }
 0xff6   : > { %1758 = vrot.lane.b32.xlu0 %v2819_v36, %s3053_s24  ;;  %1796 = vrot.lane.b32.xlu1 %v1792_v30, %s3055_s10 }
 0xffa   : > { %1798 = vrot.lane.b32.xlu0 %v1793_v26, %s3055_s10 }
0x1064   : > { %v1757_v37 = vpop.permute.xlu1 %1756 }
0x1065   : > { %v1762_v39 = vmul.f32 %v2813_v57, %v1757_v37 }
0x1067   : > { %v3677_v17 = vmul.f32 %v1762_v39, %v1645_v25 }
0x1068   : > { %v1759_v31 = vpop.permute.xlu0 %1758  ;;  %v1797_v41 = vpop.permute.xlu1 %1796 }
0x1069   : > { %v1763_v43 = vmul.f32 %v2815_v0, %v1759_v31  ;;  %v1802_v45 = vadd.f32 %v1797_v41, %v3677_v17 }
0x106b   : > { %1806 = vrot.lane.b32.xlu1 %v1802_v45, %s3055_s10  ;;  %v3681_v5 = vmul.f32 %v1763_v43, %v1650_v28  ;;  %v2489_v45 = vld [vmem:[%s3931_s1 + $0x60] sm:$0xff] }
0x106c   : > { %v1799_v20 = vpop.permute.xlu0 %1798 }
0x106d   : > { %v1803_v51 = vadd.f32 %v1799_v20, %v3681_v5 }
0x106f   : > { %1808 = vrot.lane.b32.xlu0 %v1803_v51, %s3055_s10  ;;  %1770 = vrot.lane.b32.xlu1 %v1766_v46, %s3053_s24  ;;  %v2490_v46 = vld [vmem:[%s3931_s1 + $0x68] sm:$0xff] }
0x1073   : > { %1772 = vrot.lane.b32.xlu0 %v1767_v23, %s3053_s24 }
0x10dd   : > { %v1807_v53 = vpop.permute.xlu1 %1806 }
0x10de   : > { %1812 = vst.msk [vmem:[#allocation3] sm:$0xff] %vm456_vm1, %v1807_v53 }
0x10e1   : > { %v1809_v38 = vpop.permute.xlu0 %1808  ;;  %v1771_v57 = vpop.permute.xlu1 %1770 }
0x10e2   : > { %1813 = vst.msk [vmem:[#allocation3 + $0x8] sm:$0xff] %vm456_vm1, %v1809_v38  ;;  %v1776_v62 = vadd.f32 %v1771_v57, %v1764_v54 }
0x10e4   : > { %1780 = vrot.lane.b32.xlu1 %v1776_v62, %s3056_s19 }
0x10e5   : > { %v1773_v63 = vpop.permute.xlu0 %1772  ;;  %v3691_v8 = vld [vmem:[#allocation3] sm:$0xff] }
0x10e6   : > { %v1777_v0 = vadd.f32 %v1773_v63, %v1765_v47 }
0x10e8   : > { %1782 = vrot.lane.b32.xlu0 %v1777_v0, %s3056_s19 }
0x10e9   : > { %v3693_v44 = vld [vmem:[#allocation3 + $0x8] sm:$0xff] }
0x10ea   : > { %v1857_v33 = vpack.c.bf16 %v3693_v44, %v3691_v8 }
0x10ec   : > { %2616 = vmatmul.mubr.msk.bf16.vlgmr.msra.gmra.mxu0 %vm456_vm1, %v1857_v33 }
0x1156   : > { %v1781_v6 = vpop.permute.xlu1 %1780 }
0x1157   : > { %1786 = vst.msk [vmem:[#allocation4] sm:$0xff] %vm456_vm1, %v1781_v6 }
0x115a   : > { %v1783_v58 = vpop.permute.xlu0 %1782 }
0x115b   : > { %1787 = vst.msk [vmem:[#allocation4 + $0x8] sm:$0xff] %vm456_vm1, %v1783_v58 }
0x115e   : > { %v1918_v27 = vld [vmem:[#allocation4] sm:$0xff] }
0x1162   : > { %v1919_v48 = vld [vmem:[#allocation4 + $0x8] sm:$0xff] }
0x11ac   : > { %v1895_v12 = vpop.f32.mrf.mxu0 }
0x11ad   : > { %v1902_v7 = vadd.f32 %v1895_v12, %v610_v11 }
0x11ae   : > { %v2617_v14 = vpop.f32.mrf.mxu0 }
0x11af   : > { %2820 = vtanh.f32 %v1902_v7  ;;  %v2492_v28 = vmul.f32 -1.442695, %v1902_v7 }
0x11b0   : > { %v1898_v4 = vpop.f32.mrf.mxu0 }
0x11b1   : > { %v1903_v19 = vadd.f32 %v1898_v4, %v613_v15 }
0x11b2   : > { %v2618_v21 = vpop.f32.mrf.mxu0 }
0x11b3   : > { %2822 = vtanh.f32 %v1903_v19  ;;  %v2493_v50 = vmul.f32 -1.442695, %v1903_v19 }
0x11b4   : > { %2824 = vpow2.f32 %v2492_v28 }
0x11b5   : > { %2826 = vpow2.f32 %v2493_v50 }
0x11bc   : > { %v2821_v25 = vpop.eup %2820 }
0x11bd   : > { %1932 = vrot.lane.b32.xlu1 %v2821_v25, %s3053_s24 }
0x11c0   : > { %v2823_v60 = vpop.eup %2822 }
0x11c1   : > { %1934 = vrot.lane.b32.xlu0 %v2823_v60, %s3053_s24  ;;  %1922 = vrot.lane.b32.xlu1 %v1918_v27, %s3053_s24  ;;  %v2825_v30 = vpop.eup %2824 }
0x11c2   : > { %v1910_v35 = vadd.f32 1.0, %v2825_v30  ;;  %v2827_v36 = vpop.eup %2826 }
0x11c3   : > { %v1911_v26 = vadd.f32 1.0, %v2827_v36 }
0x11c4   : > { %2828 = vrcp.f32 %v1910_v35 }
0x11c5   : > { %1924 = vrot.lane.b32.xlu0 %v1919_v48, %s3053_s24  ;;  %2830 = vrcp.f32 %v1911_v26 }
0x11d1   : > { %v2829_v37 = vpop.eup %2828 }
0x11d2   : > { %v2831_v41 = vpop.eup %2830 }
0x122f   : > { %v1933_v39 = vpop.permute.xlu1 %1932 }
0x1230   : > { %v1938_v31 = vmul.f32 %v2829_v37, %v1933_v39 }
0x1232   : > { %1942 = vrot.lane.b32.xlu1 %v1938_v31, %s3053_s24 }
0x1233   : > { %v1935_v43 = vpop.permute.xlu0 %1934  ;;  %v1923_v51 = vpop.permute.xlu1 %1922 }
0x1234   : > { %v1939_v20 = vmul.f32 %v2831_v41, %v1935_v43  ;;  %v1928_v23 = vmul.f32 %v2829_v37, %v1923_v51  ;;  %v618_v51 = vadd.f32 %v3653_v34, %v3596_v18 }
0x1236   : > { %1944 = vrot.lane.b32.xlu0 %v1939_v20, %s3053_s24  ;;  %1842 = vperm.xlu1 %2719, %v2489_v45  }
0x1237   : > { %v1925_v53 = vpop.permute.xlu0 %1924 }
0x1238   : > { %v1929_v57 = vmul.f32 %v2831_v41, %v1925_v53 }
0x123a   : > { %1847 = vperm.xlu0 %2718, %v2490_v46  }
0x12a4   : > { %v1943_v54 = vpop.permute.xlu1 %1942 }
0x12a5   : > { %v1948_v38 = vadd.f32 %v1943_v54, %v1928_v23 }
0x12a7   : > { %2832 = vtanh.f32 %v1948_v38 }
0x12a8   : > { %v1945_v62 = vpop.permute.xlu0 %1944 }
0x12a9   : > { %v1949_v47 = vadd.f32 %v1945_v62, %v1929_v57 }
0x12ab   : > { %2834 = vtanh.f32 %v1949_v47 }
0x12b1   : > { %v1843_v63 = vpop.permute.xlu1 %1842 }
0x12b2   : > { %v1850_v0 = vsub.f32 1.0, %v1843_v63  ;;  %v1962_v36 = vmul.f32 %v1948_v38, %v1843_v63  ;;  %v621_v38 = vadd.f32 %v3653_v34, %v3600_v49 }
0x12b4   : > { %v2833_v33 = vpop.eup %2832  ;;  %v1990_v58 = vmul.f32 %v3691_v8, %v1850_v0  ;;  %v1964_v50 = vmul.f32 %v1918_v27, %v1850_v0 }
0x12b5   : > { %v1848_v6 = vpop.permute.xlu0 %1847  ;;  %1954 = vrot.lane.b32.xlu1 %v2833_v33, %s3053_s24 }
0x12b6   : > { %v1851_v11 = vsub.f32 1.0, %v1848_v6  ;;  %v1963_v27 = vmul.f32 %v1949_v47, %v1848_v6 }
0x12b8   : > { %v2835_v12 = vpop.eup %2834  ;;  %v1991_v7 = vmul.f32 %v3693_v44, %v1851_v11  ;;  %v1965_v44 = vmul.f32 %v1919_v48, %v1851_v11 }
0x12b9   : > { %1956 = vrot.lane.b32.xlu0 %v2835_v12, %s3053_s24  ;;  %1994 = vrot.lane.b32.xlu1 %v1990_v58, %s3055_s10 }
0x12bd   : > { %1996 = vrot.lane.b32.xlu0 %v1991_v7, %s3055_s10 }
0x1327   : > { %v1955_v14 = vpop.permute.xlu1 %1954 }
0x1328   : > { %v1960_v15 = vmul.f32 %v2829_v37, %v1955_v14 }
0x132a   : > { %v3722_v4 = vmul.f32 %v1960_v15, %v1843_v63 }
0x132b   : > { %v1957_v19 = vpop.permute.xlu0 %1956  ;;  %v1995_v21 = vpop.permute.xlu1 %1994 }
0x132c   : > { %v1961_v25 = vmul.f32 %v2831_v41, %v1957_v19  ;;  %v2000_v60 = vadd.f32 %v1995_v21, %v3722_v4 }
0x132e   : > { %2004 = vrot.lane.b32.xlu1 %v2000_v60, %s3055_s10  ;;  %v3726_v8 = vmul.f32 %v1961_v25, %v1848_v6  ;;  %v2494_v25 = vld [vmem:[%s3931_s1 + $0x70] sm:$0xff] }
0x132f   : > { %v1997_v28 = vpop.permute.xlu0 %1996 }
0x1330   : > { %v2001_v30 = vadd.f32 %v1997_v28, %v3726_v8  ;;  %v2495_v28 = vld [vmem:[%s3931_s1 + $0x78] sm:$0xff] }
0x1332   : > { %2006 = vrot.lane.b32.xlu0 %v2001_v30, %s3055_s10  ;;  %1968 = vrot.lane.b32.xlu1 %v1964_v50, %s3053_s24 }
0x1336   : > { %1970 = vrot.lane.b32.xlu0 %v1965_v44, %s3053_s24 }
0x13a0   : > { %v2005_v35 = vpop.permute.xlu1 %2004 }
0x13a1   : > { %2010 = vst.msk [vmem:[#allocation3] sm:$0xff] %vm456_vm1, %v2005_v35 }
0x13a4   : > { %v2007_v26 = vpop.permute.xlu0 %2006  ;;  %v1969_v37 = vpop.permute.xlu1 %1968 }
0x13a5   : > { %2011 = vst.msk [vmem:[#allocation3 + $0x8] sm:$0xff] %vm456_vm1, %v2007_v26  ;;  %v1974_v39 = vadd.f32 %v1969_v37, %v1962_v36 }
0x13a7   : > { %1978 = vrot.lane.b32.xlu1 %v1974_v39, %s3056_s19 }
0x13a8   : > { %v1971_v31 = vpop.permute.xlu0 %1970  ;;  %v2053_v43 = vld [vmem:[#allocation3] sm:$0xff] }
0x13a9   : > { %v1975_v41 = vadd.f32 %v1971_v31, %v1963_v27 }
0x13ab   : > { %1980 = vrot.lane.b32.xlu0 %v1975_v41, %s3056_s19 }
0x13ac   : > { %v2054_v48 = vld [vmem:[#allocation3 + $0x8] sm:$0xff] }
0x13ad   : > { %v2055_v45 = vpack.c.bf16 %v2054_v48, %v2053_v43 }
0x13af   : > { %2624 = vmatmul.mubr.msk.bf16.vlgmr.msra.gmra.mxu1 %vm456_vm1, %v2055_v45 }
0x1419   : > { %v1979_v20 = vpop.permute.xlu1 %1978 }
0x141a   : > { %1984 = vst.msk [vmem:[#allocation4] sm:$0xff] %vm456_vm1, %v1979_v20  ;;  %v825_v20 = vld [vmem:[#allocation10] sm:$0xff] }
0x141d   : > { %v1981_v46 = vpop.permute.xlu0 %1980 }
0x141e   : > { %1985 = vst.msk [vmem:[#allocation4 + $0x8] sm:$0xff] %vm456_vm1, %v1981_v46 }
0x1421   : > { %v2116_v33 = vld [vmem:[#allocation4] sm:$0xff] }
0x1425   : > { %v2117_v18 = vld [vmem:[#allocation4 + $0x8] sm:$0xff] }
0x146f   : > { %v2093_v23 = vpop.f32.mrf.mxu1 }
0x1470   : > { %v2100_v53 = vadd.f32 %v2093_v23, %v618_v51 }
0x1471   : > { %v2625_v54 = vpop.f32.mrf.mxu1 }
0x1472   : > { %2836 = vtanh.f32 %v2100_v53  ;;  %v2497_v6 = vmul.f32 -1.442695, %v2100_v53  ;;  %v1023_v53 = vld [vmem:[#allocation10 + $0x10] sm:$0xff] }
0x1473   : > { %v2096_v57 = vpop.f32.mrf.mxu1 }
0x1474   : > { %v2101_v62 = vadd.f32 %v2096_v57, %v621_v38  ;;  %v1221_v38 = vld [vmem:[#allocation10 + $0x20] sm:$0xff]  ;;  %v1222_v57 = vld [vmem:[#allocation10 + $0x28] sm:$0xff] }
0x1475   : > { %v2626_v47 = vpop.f32.mrf.mxu1 }
0x1476   : > { %2838 = vtanh.f32 %v2101_v62  ;;  %v2498_v49 = vmul.f32 -1.442695, %v2101_v62  ;;  %v1419_v62 = vld [vmem:[#allocation10 + $0x30] sm:$0xff]  ;;  %v1420_v47 = vld [vmem:[#allocation10 + $0x38] sm:$0xff] }
0x1477   : > { %2840 = vpow2.f32 %v2497_v6 }
0x1478   : > { %2842 = vpow2.f32 %v2498_v49 }
0x147f   : > { %v2837_v63 = vpop.eup %2836 }
0x1480   : > { %2130 = vrot.lane.b32.xlu1 %v2837_v63, %s3053_s24 }
0x1483   : > { %v2839_v0 = vpop.eup %2838 }
0x1484   : > { %2132 = vrot.lane.b32.xlu0 %v2839_v0, %s3053_s24  ;;  %2120 = vrot.lane.b32.xlu1 %v2116_v33, %s3053_s24  ;;  %v2841_v34 = vpop.eup %2840 }
0x1485   : > { %v2108_v58 = vadd.f32 1.0, %v2841_v34  ;;  %v2843_v11 = vpop.eup %2842 }
0x1486   : > { %v2109_v12 = vadd.f32 1.0, %v2843_v11 }
0x1487   : > { %2844 = vrcp.f32 %v2108_v58 }
0x1488   : > { %2122 = vrot.lane.b32.xlu0 %v2117_v18, %s3053_s24  ;;  %2846 = vrcp.f32 %v2109_v12 }
0x1494   : > { %v3747_v7 = vpop.eup %2844 }
0x1495   : > { %v3751_v19 = vpop.eup %2846 }
0x14f2   : > { %v2131_v14 = vpop.permute.xlu1 %2130 }
0x14f3   : > { %v2136_v15 = vmul.f32 %v3747_v7, %v2131_v14 }
0x14f5   : > { %2140 = vrot.lane.b32.xlu1 %v2136_v15, %s3053_s24 }
0x14f6   : > { %v2133_v21 = vpop.permute.xlu0 %2132  ;;  %v2121_v50 = vpop.permute.xlu1 %2120 }
0x14f7   : > { %v2137_v60 = vmul.f32 %v3751_v19, %v2133_v21  ;;  %v2126_v45 = vmul.f32 %v3747_v7, %v2121_v50 }
0x14f9   : > { %2142 = vrot.lane.b32.xlu0 %v2137_v60, %s3053_s24  ;;  %2040 = vperm.xlu1 %2719, %v2494_v25  }
0x14fa   : > { %v2123_v30 = vpop.permute.xlu0 %2122 }
0x14fb   : > { %v2127_v23 = vmul.f32 %v3751_v19, %v2123_v30 }
0x14fd   : > { %2045 = vperm.xlu0 %2718, %v2495_v28  }
0x1567   : > { %v2141_v44 = vpop.permute.xlu1 %2140 }
0x1568   : > { %v2146_v46 = vadd.f32 %v2141_v44, %v2126_v45 }
0x156a   : > { %2848 = vtanh.f32 %v2146_v46 }
0x156b   : > { %v2143_v35 = vpop.permute.xlu0 %2142 }
0x156c   : > { %v2147_v54 = vadd.f32 %v2143_v35, %v2127_v23 }
0x156e   : > { %2850 = vtanh.f32 %v2147_v54 }
0x1574   : > { %v3761_v36 = vpop.permute.xlu1 %2040 }
0x1575   : > { %v2048_v26 = vsub.f32 1.0, %v3761_v36 }
0x1577   : > { %v2188_v37 = vmul.f32 %v2053_v43, %v2048_v26  ;;  %v2162_v31 = vmul.f32 %v2116_v33, %v2048_v26  ;;  %v826_v43 = vld [vmem:[#allocation10 + $0x8] sm:$0xff]  ;;  %v2849_v63 = vpop.eup %2848 }
0x1578   : > { %v3764_v39 = vpop.permute.xlu0 %2045 }
0x1579   : > { %v2049_v27 = vsub.f32 1.0, %v3764_v39  ;;  %2192 = vrot.lane.b32.xlu1 %v2188_v37, %s3055_s10 }
0x157b   : > { %v2189_v41 = vmul.f32 %v2054_v48, %v2049_v27  ;;  %v2163_v51 = vmul.f32 %v2117_v18, %v2049_v27  ;;  %v1024_v48 = vld [vmem:[#allocation10 + $0x18] sm:$0xff]  ;;  %v2851_v0 = vpop.eup %2850 }
0x157d   : > { %2194 = vrot.lane.b32.xlu0 %v2189_v41, %s3055_s10  ;;  %2166 = vrot.lane.b32.xlu1 %v2162_v31, %s3053_s24 }
0x1581   : > { %2168 = vrot.lane.b32.xlu0 %v2163_v51, %s3053_s24  ;;  %829 = vrot.lane.b32.xlu1 %v825_v20, %s3055_s10 }
0x1585   : > { %831 = vrot.lane.b32.xlu0 %v826_v43, %s3055_s10  ;;  %1027 = vrot.lane.b32.xlu1 %v1023_v53, %s3055_s10 }
0x1589   : > { %1029 = vrot.lane.b32.xlu0 %v1024_v48, %s3055_s10  ;;  %1225 = vrot.lane.b32.xlu1 %v1221_v38, %s3055_s10 }
0x158d   : > { %1227 = vrot.lane.b32.xlu0 %v1222_v57, %s3055_s10  ;;  %1423 = vrot.lane.b32.xlu1 %v1419_v62, %s3055_s10 }
0x1591   : > { %1425 = vrot.lane.b32.xlu0 %v1420_v47, %s3055_s10  ;;  %2152 = vrot.lane.b32.xlu1 %v2849_v63, %s3053_s24 }
0x1595   : > { %2154 = vrot.lane.b32.xlu0 %v2851_v0, %s3053_s24  ;;  %1621 = vrot.lane.b32.xlu1 %v3527_v59, %s3055_s10  ;;  %s3057_s24 = smov [#allocation11]  }
0x1599   : > { %1623 = vrot.lane.b32.xlu0 %v3529_v61, %s3055_s10  ;;  %1819 = vrot.lane.b32.xlu1 %v3531_v32, %s3055_s10  ;;  %v2160_v61 = vmul.f32 %v2146_v46, %v3761_v36 }
0x159d   : > { %1821 = vrot.lane.b32.xlu0 %v3536_v1, %s3055_s10  ;;  %2017 = vrot.lane.b32.xlu1 %v3538_v2, %s3055_s10  ;;  %v2161_v1 = vmul.f32 %v2147_v54, %v3764_v39 }
0x15a1   : > { %2019 = vrot.lane.b32.xlu0 %v3540_v3, %s3055_s10  ;;  %2215 = vrot.lane.b32.xlu1 %v3553_v9, %s3055_s10 }
0x15a5   : > { %2217 = vrot.lane.b32.xlu0 %v3555_v10, %s3055_s10 }
0x15eb   : > { %v2193_v59 = vpop.permute.xlu1 %2192 }
0x15ef   : > { %v2195_v33 = vpop.permute.xlu0 %2194  ;;  %v2167_v32 = vpop.permute.xlu1 %2166 }
0x15f0   : > { %v2172_v18 = vadd.f32 %v2167_v32, %v2160_v61 }
0x15f2   : > { %2176 = vrot.lane.b32.xlu1 %v2172_v18, %s3056_s19 }
0x15f3   : > { %v2169_v2 = vpop.permute.xlu0 %2168  ;;  %v830_v6 = vpop.permute.xlu1 %829 }
0x15f4   : > { %v2173_v49 = vadd.f32 %v2169_v2, %v2161_v1  ;;  %v835_v3 = vadd.f32 %v830_v6, %v3359_v16 }
0x15f6   : > { %2178 = vrot.lane.b32.xlu0 %v2173_v49, %s3056_s19  ;;  %839 = vrot.lane.b32.xlu1 %v835_v3, %s3055_s10  ;;  %s3947_s19 = sadd.s32 4294967295, %s3045_s29  }
0x15f7   : > { %v832_v9 = vpop.permute.xlu0 %831  ;;  %v1028_v10 = vpop.permute.xlu1 %1027  ;;  %p3861_p7 = scmp.eq.s32.totalorder %s3947_s19, 1 }
0x15f8   : > { %v836_v34 = vadd.f32 %v832_v9, %v3363_v24  ;;  %v1033_v58 = vadd.f32 %v1028_v10, %v3420_v29 }
0x15fa   : > { %841 = vrot.lane.b32.xlu0 %v836_v34, %s3055_s10  ;;  %1037 = vrot.lane.b32.xlu1 %v1033_v58, %s3055_s10 }
0x15fb   : > { %v1030_v11 = vpop.permute.xlu0 %1029  ;;  %v1226_v12 = vpop.permute.xlu1 %1225 }
0x15fc   : > { %v1034_v14 = vadd.f32 %v1030_v11, %v3424_v42  ;;  %v1231_v16 = vadd.f32 %v1226_v12, %v3475_v52 }
0x15fe   : > { %1039 = vrot.lane.b32.xlu0 %v1034_v14, %s3055_s10  ;;  %1235 = vrot.lane.b32.xlu1 %v1231_v16, %s3055_s10 }
0x15ff   : > { %v1228_v15 = vpop.permute.xlu0 %1227  ;;  %v1424_v21 = vpop.permute.xlu1 %1423 }
0x1600   : > { %v1232_v24 = vadd.f32 %v1228_v15, %v3479_v55  ;;  %v1429_v29 = vadd.f32 %v1424_v21, %v3562_v13 }
0x1602   : > { %1237 = vrot.lane.b32.xlu0 %v1232_v24, %s3055_s10  ;;  %1433 = vrot.lane.b32.xlu1 %v1429_v29, %s3055_s10 }
0x1603   : > { %v1426_v25 = vpop.permute.xlu0 %1425  ;;  %v2153_v60 = vpop.permute.xlu1 %2152 }
0x1604   : > { %v1430_v42 = vadd.f32 %v1426_v25, %v3566_v22  ;;  %v2158_v52 = vmul.f32 %v3747_v7, %v2153_v60 }
0x1606   : > { %1435 = vrot.lane.b32.xlu0 %v1430_v42, %s3055_s10  ;;  %v2184_v30 = vmul.f32 %v2158_v52, %v3761_v36 }
0x1607   : > { %v2155_v28 = vpop.permute.xlu0 %2154  ;;  %v1622_v50 = vpop.permute.xlu1 %1621 }
0x1608   : > { %v2159_v55 = vmul.f32 %v3751_v19, %v2155_v28  ;;  %v1627_v13 = vadd.f32 %v1622_v50, %v3624_v56  ;;  %v2198_v26 = vadd.f32 %v2193_v59, %v2184_v30 }
0x160a   : > { %1631 = vrot.lane.b32.xlu1 %v1627_v13, %s3055_s10  ;;  %v2185_v37 = vmul.f32 %v2159_v55, %v3764_v39 }
0x160b   : > { %v1624_v44 = vpop.permute.xlu0 %1623  ;;  %v1820_v35 = vpop.permute.xlu1 %1819 }
0x160c   : > { %v1628_v22 = vadd.f32 %v1624_v44, %v3628_v40  ;;  %v2199_v36 = vadd.f32 %v2195_v33, %v2185_v37  ;;  %v1825_v19 = vadd.f32 %v1820_v35, %v3677_v17 }
0x160e   : > { %1633 = vrot.lane.b32.xlu0 %v1628_v22, %s3055_s10  ;;  %2202 = vrot.lane.b32.xlu1 %v2198_v26, %s3055_s10 }
0x160f   : > { %v1822_v7 = vpop.permute.xlu0 %1821  ;;  %v2018_v27 = vpop.permute.xlu1 %2017 }
0x1610   : > { %v1826_v31 = vadd.f32 %v1822_v7, %v3681_v5  ;;  %v2023_v39 = vadd.f32 %v2018_v27, %v3722_v4 }
0x1612   : > { %2204 = vrot.lane.b32.xlu0 %v2199_v36, %s3055_s10  ;;  %1829 = vrot.lane.b32.xlu1 %v1825_v19, %s3055_s10 }
0x1613   : > { %v2020_v56 = vpop.permute.xlu0 %2019  ;;  %v2216_v41 = vpop.permute.xlu1 %2215 }
0x1614   : > { %v2024_v40 = vadd.f32 %v2020_v56, %v3726_v8  ;;  %v2221_v45 = vadd.f32 %v2216_v41, %v2184_v30 }
0x1616   : > { %1831 = vrot.lane.b32.xlu0 %v1826_v31, %s3055_s10  ;;  %2027 = vrot.lane.b32.xlu1 %v2023_v39, %s3055_s10 }
0x1617   : > { %v2218_v20 = vpop.permute.xlu0 %2217 }
0x1618   : > { %v2222_v17 = vadd.f32 %v2218_v20, %v2185_v37 }
0x161a   : > { %2029 = vrot.lane.b32.xlu0 %v2024_v40, %s3055_s10  ;;  %2225 = vrot.lane.b32.xlu1 %v2221_v45, %s3055_s10 }
0x161e   : > { %2227 = vrot.lane.b32.xlu0 %v2222_v17, %s3055_s10  ;;  %s2266_s10 = sshll.u32 %s3057_s24, 4  ;;  %s2267_s10 = int_to_ptr.vmem [resolvable:$true] %s2266_s10 }
0x161f   : > { %s2911_s17 = scalar_lea.vmem %s2267_s10, 256  ;;  %p2918_p6 = scmp.lt.s32.totalorder %s2267_s10, %s2267_s10 }
0x1620   : > { %p2912_p3 = scmp.ne.s32.totalorder %s2267_s10, %s2911_s17  ;;  %p2919_p8 = scmp.lt.s32.totalorder %s2911_s17, %s2911_s17 }
0x1622   : > { %p2913_p4 = pnand %p2912_p3, %p3861_p7  ;;  %p2920_p11 = por %p2919_p8, %p2918_p6 }
0x1624   : > { %p2914_p5 = pneg %p2913_p4 }
0x1626   : > { %p2921_p12 = pnand %p2920_p11, %p2914_p5 }
0x1664   : > { %v2177_v46 = vpop.permute.xlu1 %2176 }
0x1665   : > { %2182 = vst.msk [vmem:[#allocation4] sm:$0xff] %vm456_vm1, %v2177_v46 }
0x1668   : > { %v2179_v5 = vpop.permute.xlu0 %2178  ;;  %v840_v4 = vpop.permute.xlu1 %839 }
0x1669   : > { %2183 = vst.msk [vmem:[#allocation4 + $0x8] sm:$0xff] %vm456_vm1, %v2179_v5  ;;  %845 = vst.msk [vmem:[#allocation10] sm:$0xff] %vm456_vm1, %v840_v4 }
0x166c   : > { %v842_v51 = vpop.permute.xlu0 %841  ;;  %v1038_v8 = vpop.permute.xlu1 %1037  ;;  %v2237_v23 = vld [vmem:[#allocation4] sm:$0xff] }
0x166d   : > { %846 = vst.msk [vmem:[#allocation10 + $0x8] sm:$0xff] %vm456_vm1, %v842_v51  ;;  %1043 = vst.msk [vmem:[#allocation10 + $0x10] sm:$0xff] %vm456_vm1, %v1038_v8 }
0x166e   : > { %2239 = vst.msk [vmem:[#allocation13] sm:$0xff] %vm456_vm1, %v2237_v23 }
0x1670   : > { %v1040_v43 = vpop.permute.xlu0 %1039  ;;  %v1236_v53 = vpop.permute.xlu1 %1235  ;;  %v2238_v54 = vld [vmem:[#allocation4 + $0x8] sm:$0xff] }
0x1671   : > { %1044 = vst.msk [vmem:[#allocation10 + $0x18] sm:$0xff] %vm456_vm1, %v1040_v43  ;;  %1241 = vst.msk [vmem:[#allocation10 + $0x20] sm:$0xff] %vm456_vm1, %v1236_v53 }
0x1672   : > { %2240 = vst.msk [vmem:[#allocation13 + $0x8] sm:$0xff] %vm456_vm1, %v2238_v54 }
0x1674   : > { %v1238_v48 = vpop.permute.xlu0 %1237  ;;  %v1434_v38 = vpop.permute.xlu1 %1433 }
0x1675   : > { %1242 = vst.msk [vmem:[#allocation10 + $0x28] sm:$0xff] %vm456_vm1, %v1238_v48  ;;  %1439 = vst.msk [vmem:[#allocation10 + $0x30] sm:$0xff] %vm456_vm1, %v1434_v38 }
0x1678   : > { %v1436_v57 = vpop.permute.xlu0 %1435 }
0x1679   : > { %1440 = vst.msk [vmem:[#allocation10 + $0x38] sm:$0xff] %vm456_vm1, %v1436_v57 }
0x167c   : > { %v1632_v62 = vpop.permute.xlu1 %1631 }
0x167d   : > { %1637 = vst.msk [vmem:[#allocation10 + $0x40] sm:$0xff] %vm456_vm1, %v1632_v62 }
0x1680   : > { %v1634_v47 = vpop.permute.xlu0 %1633  ;;  %v2203_v63 = vpop.permute.xlu1 %2202 }
0x1681   : > { %1638 = vst.msk [vmem:[#allocation10 + $0x48] sm:$0xff] %vm456_vm1, %v1634_v47  ;;  %2208 = vst.msk [vmem:[#allocation3] sm:$0xff] %vm456_vm1, %v2203_v63 }
0x1684   : > { %v2205_v0 = vpop.permute.xlu0 %2204  ;;  %v1830_v59 = vpop.permute.xlu1 %1829 }
0x1685   : > { %2209 = vst.msk [vmem:[#allocation3 + $0x8] sm:$0xff] %vm456_vm1, %v2205_v0  ;;  %1835 = vst.msk [vmem:[#allocation10 + $0x50] sm:$0xff] %vm456_vm1, %v1830_v59 }
0x1688   : > { %v1832_v61 = vpop.permute.xlu0 %1831  ;;  %v2028_v33 = vpop.permute.xlu1 %2027  ;;  %v2233_v32 = vld [vmem:[#allocation3] sm:$0xff] }
0x1689   : > { %1836 = vst.msk [vmem:[#allocation10 + $0x58] sm:$0xff] %vm456_vm1, %v1832_v61  ;;  %2033 = vst.msk [vmem:[#allocation10 + $0x60] sm:$0xff] %vm456_vm1, %v2028_v33 }
0x168a   : > { %2235 = vst.msk [vmem:[#allocation11] sm:$0xff] %vm456_vm1, %v2233_v32 }
0x168c   : > { %v2030_v18 = vpop.permute.xlu0 %2029  ;;  %v2226_v1 = vpop.permute.xlu1 %2225  ;;  %v2234_v2 = vld [vmem:[#allocation3 + $0x8] sm:$0xff] }
0x168d   : > { %2034 = vst.msk [vmem:[#allocation10 + $0x68] sm:$0xff] %vm456_vm1, %v2030_v18  ;;  %2231 = vst.msk [vmem:[#allocation10 + $0x70] sm:$0xff] %vm456_vm1, %v2226_v1 }
0x168e   : > { %2236 = vst.msk [vmem:[#allocation11 + $0x8] sm:$0xff] %vm456_vm1, %v2234_v2 }
0x168f   : > { %2924 = shalt.err (!%p2921_p12)
}
0x1690   : > { %s3060_s23 = smov 128   ;;  %s3061_s14 = smov 8  }
0x1691   : > { %2634 = dma.vmem_to_hbm [thread:$0]  (%p3861_p7), %s2267_s10, 256, %s3936_s6, [#allocation12], %s3060_s23, %s3060_s23, %s3061_s14  }
0x1692   : > { %s2935_s8 = scalar_lea.vmem %s3865_s27, 256  ;;  %p2942_p2 = scmp.lt.s32.totalorder %s3865_s27, %s3865_s27 }
0x1693   : > { %p2936_p13 = scmp.ne.s32.totalorder %s3865_s27, %s2935_s8  ;;  %p2943_p9 = scmp.lt.s32.totalorder %s2935_s8, %s2935_s8 }
0x1695   : > { %p2937_p0 = pnand %p2936_p13, %p3861_p7  ;;  %p2944_p10 = por %p2943_p9, %p2942_p2 }
0x1697   : > { %p2938_p1 = pneg %p2937_p0 }
0x1699   : > { %p2945_p3 = pnand %p2944_p10, %p2938_p1 }
0x169b   : > { %2948 = shalt.err (!%p2945_p3)
}
0x169c   : > { %2636 = dma.vmem_to_hbm [thread:$0]  (%p3861_p7), %s3865_s27, 256, %s3937_s7, [#allocation12], %s3060_s23, %s3060_s23, %s3061_s14   ;;  %v2228_v6 = vpop.permute.xlu0 %2227 }
0x169d   : > { %2232 = vst.msk [vmem:[#allocation10 + $0x78] sm:$0xff] %vm456_vm1, %v2228_v6  ;;  %s2959_s22 = scalar_lea.vmem %s3870_s9, 2048  ;;  %p2966_p8 = scmp.lt.s32.totalorder %s3870_s9, %s3870_s9 }
0x169e   : > { %p2960_p4 = scmp.ne.s32.totalorder %s3870_s9, %s2959_s22  ;;  %p2967_p11 = scmp.lt.s32.totalorder %s2959_s22, %s2959_s22 }
0x16a0   : > { %p2961_p5 = pnand %p2960_p4, %p3861_p7  ;;  %p2968_p12 = por %p2967_p11, %p2966_p8 }
0x16a2   : > { %p2962_p6 = pneg %p2961_p5 }
0x16a4   : > { %p2969_p13 = pnand %p2968_p12, %p2962_p6 }
0x16a6   : > { %2972 = shalt.err (!%p2969_p13)
}
0x16a7   : > { %2632 = dma.vmem_to_hbm [thread:$0]  (%p3861_p7), %s3870_s9, 2048, %s3935_s5, [#allocation7], %s3060_s23, %s3060_s23, %s3061_s14  }
0x16a8   : > { %3016 = dma.done.wait (%p3861_p7), [#allocation7], 2048  }
0x16a9   : > { %3018 = vsyncadd (%p3861_p7), [#allocation7], 4294965248 }
0x16aa   : > { %3020 = dma.done.wait (%p3861_p7), [#allocation12], 512  }
0x16ab   : > { %3022 = vsyncadd (%p3861_p7), [#allocation12], 4294966784 }
0x16ac PF: > { %s26_s29 = sadd.s32 1, %s3045_s29   ;;  %s3949_s10 = sld [smem:[#allocation18_spill]] }
0x16ad   : > { %p23_p0 = scmp.ge.s32.totalorder %s26_s29, 4   ;;  %s3950_s24 = smov %s3029_s25 }
0x16ae   : > { %s3951_s25 = smov %s3033_s26  ;;  %s3952_s26 = smov %s3153_s13 }
0x16af   : > { %s3953_s27 = smov %s3041_s28  ;;  %25 = sbr.rel (!%p23_p0) target bundleno = 10 (0xa), region = 143 }
0x16b2   : > { %s3954_s28 = smov %s3949_s10 }
0x16b4   :  { %2306 = vsyncpa [#allocation6], 1 }
0x16b5   :  { %2308 = vsyncpa [#allocation6 + $0x1], 1 }
0x16b6   :  { %2309 = vsyncpa [#allocation9], 1 }
0x16b7   :  { %2311 = vsyncpa [#allocation9 + $0x1], 1 }
0x16b8   :  { %2312 = vsyncpa [#allocation7], 1 }
0x16b9   :  { %2314 = vsyncpa [#allocation7 + $0x1], 1 }
0x16ba   :  { %2315 = vsyncpa [#allocation12], 1 }

</bundles_post_ra>
